<compile_context>
chip_gen: v7x
topology: tpu7x:2x2x1
jax: 0.10.0
libtpu: 0.0.40
codegen_flags: <defaults>
</compile_context>

<pallas_src>
import functools

import jax
import jax.numpy as jnp
from jax import lax
from jax.experimental import pallas as pl
from jax.experimental.pallas import tpu as pltpu


# ----------------------------------------------------------------------------
# Pallas kernel: wavefront stacked LSTM (PyTorch gate order i,f,g,o) + FC.
# ----------------------------------------------------------------------------
def _lstm_wave_kernel(x_ref, wih0_ref, addb_ref, wbig_ref, wfc_ref, bfc_ref,
                      out_ref, add_ref, *, B, T, H, L):
    # x_ref    : (T*B, 1)        x[b, t] laid out time-major, batch padded to B
    # wih0_ref : (1, 4*L*H)      layer-0 input weights scattered to layer-0 cols
    # addb_ref : (1, 4*L*H)      all per-layer biases (b_ih + b_hh), gate-major
    # wbig_ref : (L*H, 4*L*H)    fused block-bidiagonal recurrent weight (bf16)
    # wfc_ref  : (L*H, C_pad)    fc weight on the top-layer block only (bf16)
    # bfc_ref  : (1, C_pad)      fc bias (lane padded)
    # out_ref  : (B, C_pad)
    # add_ref  : (T*B, 4*L*H)    scratch: per-timestep additive gate term
    LH = L * H
    G = 4 * LH

    # Hoist the layer-0 rank-1 input projection + all biases out of the
    # recurrence (one broadcast MAC; per-wave reads are dense aligned rows).
    add_ref[...] = x_ref[...] * wih0_ref[...] + addb_ref[...]

    w_big = wbig_ref[...]                      # (LH, G) bf16, loaded once

    h = jnp.zeros((B, LH), jnp.float32)        # [h_0 | h_1 | ... ] fused state
    c = jnp.zeros((B, LH), jnp.float32)

    # Wave w: layer l processes time step t = w - l (valid when 0 <= t < T).
    for w in range(T + L - 1):
        t0 = min(w, T - 1)                     # clamp: stale layer-0 rows are
                                               # never consumed (see below)
        z = jnp.dot(h.astype(jnp.bfloat16), w_big,
                    preferred_element_type=jnp.float32)
        z = z + add_ref[pl.ds(t0 * B, B), :]   # (B, G), gate-major columns

        # EUP only where needed: sigmoid on [i|f] and [o], tanh on [g].
        sif = jax.nn.sigmoid(z[:, 0 * LH:2 * LH])
        i_g = sif[:, 0:LH]
        f_g = sif[:, LH:2 * LH]
        g_g = jnp.tanh(z[:, 2 * LH:3 * LH])
        o_g = jax.nn.sigmoid(z[:, 3 * LH:4 * LH])

        c_new = f_g * c + i_g * g_g
        h_new = o_g * jnp.tanh(c_new)

        if w < L - 1:
            # Layers above the wavefront have not started yet: keep them zero.
            lane = lax.broadcasted_iota(jnp.int32, (1, LH), 1)
            live = lane < (w + 1) * H
            h = jnp.where(live, h_new, h)
            c = jnp.where(live, c_new, c)
        else:
            # Lower layers that already finished (w >= T + l) get a bogus extra
            # update here, but their values are never read again (layer l+1's
            # last read of h_l is the pre-wave value at wave T+l) and the FC
            # weight is zero outside the top-layer block, so it is harmless.
            h, c = h_new, c_new

    # FC on the final hidden state of the top layer (== out[:, -1, :]).
    out = jnp.dot(h.astype(jnp.bfloat16), wfc_ref[...],
                  preferred_element_type=jnp.float32) + bfc_ref[...]
    out_ref[...] = out.astype(out_ref.dtype)


# ----------------------------------------------------------------------------
# Wrapper: pack PyTorch-layout LSTM weights into the fused wavefront layout.
# ----------------------------------------------------------------------------
def mnist1d_lstm_forward(x, params, *, hidden_size, num_layers):
    """x: (B, T) float32.  Returns (B, out_channels) float32."""
    B, T = x.shape
    H = hidden_size
    L = num_layers
    C = params["fc_w"].shape[0]
    LH = L * H
    G = 4 * LH

    B_pad = max(8, ((B + 7) // 8) * 8)          # dense f32 sublanes
    C_pad = ((C + 127) // 128) * 128            # lane-dense output store

    # x laid out time-major, batch padded (extra rows compute garbage that is
    # sliced away; inputs are bounded so no inf/nan).
    x_pad = jnp.zeros((B_pad, T), jnp.float32).at[:B].set(x.astype(jnp.float32))
    x_col = jnp.transpose(x_pad).reshape(T * B_pad, 1)

    # Fused block upper-bidiagonal recurrent weight, gate-major column groups
    # [i_0..i_{L-1} | f_0..f_{L-1} | g_0..g_{L-1} | o_0..o_{L-1}].
    w_big = jnp.zeros((LH, G), jnp.float32)
    add_base = jnp.zeros((1, G), jnp.float32)
    wih0_g = jnp.zeros((1, G), jnp.float32)
    w0 = params["w_ih_0"][:, 0].astype(jnp.float32)            # (4H,)
    for l in range(L):
        whh_t = jnp.transpose(params[f"w_hh_{l}"]).astype(jnp.float32)  # (H,4H)
        b_l = (params[f"b_ih_{l}"] + params[f"b_hh_{l}"]).astype(jnp.float32)
        if l >= 1:
            wih_t = jnp.transpose(params[f"w_ih_{l}"]).astype(jnp.float32)
        for g in range(4):
            cs = g * LH + l * H                                  # column start
            w_big = w_big.at[l * H:(l + 1) * H, cs:cs + H].set(
                whh_t[:, g * H:(g + 1) * H])
            add_base = add_base.at[0, cs:cs + H].set(b_l[g * H:(g + 1) * H])
            if l >= 1:
                w_big = w_big.at[(l - 1) * H:l * H, cs:cs + H].set(
                    wih_t[:, g * H:(g + 1) * H])
            else:
                wih0_g = wih0_g.at[0, cs:cs + H].set(w0[g * H:(g + 1) * H])
    w_big = w_big.astype(jnp.bfloat16)

    # FC weight only touches the top-layer block of the fused state.
    wfc_big = jnp.zeros((LH, C_pad), jnp.float32).at[(L - 1) * H:, :C].set(
        jnp.transpose(params["fc_w"]).astype(jnp.float32)).astype(jnp.bfloat16)
    bfc = jnp.zeros((1, C_pad), jnp.float32).at[0, :C].set(
        params["fc_b"].astype(jnp.float32))

    vmem = pl.BlockSpec(memory_space=pltpu.MemorySpace.VMEM)
    kernel = functools.partial(_lstm_wave_kernel, B=B_pad, T=T, H=H, L=L)
    out = pl.pallas_call(
        kernel,
        out_shape=jax.ShapeDtypeStruct((B_pad, C_pad), jnp.float32),
        in_specs=[vmem] * 6,
        out_specs=vmem,
        scratch_shapes=[
            pltpu.VMEM((T * B_pad, G), jnp.float32),   # per-timestep add term
        ],
    )(x_col, wih0_g, add_base, w_big, wfc_big, bfc)
    return out[:B, :C]


# ----------------------------------------------------------------------------
# Deterministic parameter init (same shapes / uniform range as nn.LSTM/Linear)
# ----------------------------------------------------------------------------
def init_params(key, hidden_size, num_layers, out_channels):
    H = hidden_size
    params = {}
    k = 1.0 / jnp.sqrt(H)
    keys = jax.random.split(key, 4 * num_layers + 2)
    idx = 0
    for l in range(num_layers):
        in_sz = 1 if l == 0 else H
        params[f"w_ih_{l}"] = jax.random.uniform(keys[idx], (4 * H, in_sz),
                                                 minval=-k, maxval=k); idx += 1
        params[f"w_hh_{l}"] = jax.random.uniform(keys[idx], (4 * H, H),
                                                 minval=-k, maxval=k); idx += 1
        params[f"b_ih_{l}"] = jax.random.uniform(keys[idx], (4 * H,),
                                                 minval=-k, maxval=k); idx += 1
        params[f"b_hh_{l}"] = jax.random.uniform(keys[idx], (4 * H,),
                                                 minval=-k, maxval=k); idx += 1
    params["fc_w"] = jax.random.uniform(keys[idx], (out_channels, H),
                                        minval=-k, maxval=k); idx += 1
    params["fc_b"] = jax.random.uniform(keys[idx], (out_channels,),
                                        minval=-k, maxval=k)
    return params


# Pure-JAX reference of the PyTorch forward (for a correctness check).
def ref_forward(x, params, *, hidden_size, num_layers):
    B, T = x.shape
    H = hidden_size
    seq = x[:, :, None]                                # (B, T, 1)
    for l in range(num_layers):
        w_ih = params[f"w_ih_{l}"]
        w_hh = params[f"w_hh_{l}"]
        b = params[f"b_ih_{l}"] + params[f"b_hh_{l}"]
        h = jnp.zeros((B, H))
        c = jnp.zeros((B, H))
        outs = []
        for t in range(T):
            z = seq[:, t, :] @ w_ih.T + h @ w_hh.T + b
            i = jax.nn.sigmoid(z[:, 0 * H:1 * H])
            f = jax.nn.sigmoid(z[:, 1 * H:2 * H])
            g = jnp.tanh(z[:, 2 * H:3 * H])
            o = jax.nn.sigmoid(z[:, 3 * H:4 * H])
            c = f * c + i * g
            h = o * jnp.tanh(c)
            outs.append(h)
        seq = jnp.stack(outs, axis=1)
    return seq[:, -1, :] @ params["fc_w"].T + params["fc_b"]


if __name__ == "__main__":
    B, T = 2, 16          # batch, sequence length (mnist1d-style 1-D signal)
    H, L, C = 32, 2, 10   # hidden_size, num_layers, out_channels

    key = jax.random.PRNGKey(0)
    kx, kp = jax.random.split(key)
    x = jax.random.normal(kx, (B, T), jnp.float32)
    params = init_params(kp, H, L, C)

    out = mnist1d_lstm_forward(x, params, hidden_size=H, num_layers=L)
    out = jax.block_until_ready(out)

    ref = ref_forward(x, params, hidden_size=H, num_layers=L)
    assert out.shape == (B, C)
    # bf16 MXU operands (single-pass, as requested by the perf review) vs f32
    # reference -> allow ~1e-2 absolute slack; real bugs show up as >0.1.
    assert jnp.allclose(out, ref, atol=1e-2, rtol=1e-2), (out, ref)

    print("KERNEL_OK")
</pallas_src>

<mosaic_0001>
module attributes {stable_mosaic.version = 11 : i64} {
  func.func @_lstm_wave_kernel(%arg0: memref<128x1xf32, #tpu.memory_space<vmem>>, %arg1: memref<1x256xf32, #tpu.memory_space<vmem>>, %arg2: memref<1x256xf32, #tpu.memory_space<vmem>>, %arg3: memref<64x256xbf16, #tpu.memory_space<vmem>>, %arg4: memref<64x128xbf16, #tpu.memory_space<vmem>>, %arg5: memref<1x128xf32, #tpu.memory_space<vmem>>, %arg6: memref<8x128xf32, #tpu.memory_space<vmem>>, %arg7: memref<128x256xf32, #tpu.memory_space<vmem>>) attributes {dimension_semantics = [], scalar_prefetch = 0 : i64, scratch_operands = 1 : i64, tpu.core_type = #tpu.core_type<tc>} {
    %c0 = arith.constant 0 : index
    %c0_0 = arith.constant 0 : index
    %0 = vector.load %arg0[%c0, %c0_0] : memref<128x1xf32, #tpu.memory_space<vmem>>, vector<128x1xf32>
    %c0_1 = arith.constant 0 : index
    %c0_2 = arith.constant 0 : index
    %1 = vector.load %arg1[%c0_1, %c0_2] : memref<1x256xf32, #tpu.memory_space<vmem>>, vector<1x256xf32>
    %2 = vector.broadcast %0 : vector<128x1xf32> to vector<128x256xf32>
    %3 = vector.broadcast %1 : vector<1x256xf32> to vector<128x256xf32>
    %4 = arith.mulf %2, %3 : vector<128x256xf32>
    %c0_3 = arith.constant 0 : index
    %c0_4 = arith.constant 0 : index
    %5 = vector.load %arg2[%c0_3, %c0_4] : memref<1x256xf32, #tpu.memory_space<vmem>>, vector<1x256xf32>
    %6 = vector.broadcast %5 : vector<1x256xf32> to vector<128x256xf32>
    %7 = arith.addf %4, %6 : vector<128x256xf32>
    %c0_5 = arith.constant 0 : index
    %c0_6 = arith.constant 0 : index
    %8 = vector.load %arg7[%c0_5, %c0_6] : memref<128x256xf32, #tpu.memory_space<vmem>>, vector<128x256xf32>
    tpu.vector_store %arg7[%c0_5, %c0_6], %7 {strides = array<i32>} : memref<128x256xf32, #tpu.memory_space<vmem>>, vector<128x256xf32>,
    %c0_7 = arith.constant 0 : index
    %c0_8 = arith.constant 0 : index
    %9 = vector.load %arg3[%c0_7, %c0_8] : memref<64x256xbf16, #tpu.memory_space<vmem>>, vector<64x256xbf16>
    %cst = arith.constant 0.000000e+00 : f32
    %10 = vector.broadcast %cst : f32 to vector<8x64xf32>
    %cst_9 = arith.constant 0.000000e+00 : f32
    %11 = vector.broadcast %cst_9 : f32 to vector<8x64xf32>
    %12 = arith.truncf %10 : vector<8x64xf32> to vector<8x64xbf16>
    %cst_10 = arith.constant dense<0.000000e+00> : vector<8x256xf32>
    %13 = tpu.matmul %12, %9, %cst_10 {dimension_numbers = #tpu.dot_dimension_numbers<[1], [0], [0], [1], [0, 0, 1, 1], [], []>} : vector<8x64xbf16>, vector<64x256xbf16>, vector<8x256xf32> -> vector<8x256xf32>
    %c0_11 = arith.constant 0 : index
    %c0_12 = arith.constant 0 : index
    %14 = vector.load %arg7[%c0_11, %c0_12] : memref<128x256xf32, #tpu.memory_space<vmem>>, vector<8x256xf32>
    %15 = arith.addf %13, %14 : vector<8x256xf32>
    %16 = vector.extract_strided_slice %15 {offsets = [0, 0], sizes = [8, 128], strides = [1, 1]} : vector<8x256xf32> to vector<8x128xf32>
    %17 = arith.negf %16 : vector<8x128xf32>
    %18 = math.exp %17 : vector<8x128xf32>
    %cst_13 = arith.constant 1.000000e+00 : f32
    %19 = vector.broadcast %cst_13 : f32 to vector<8x128xf32>
    %20 = arith.addf %19, %18 : vector<8x128xf32>
    %21 = arith.divf %19, %20 : vector<8x128xf32>
    %22 = vector.extract_strided_slice %21 {offsets = [0, 0], sizes = [8, 64], strides = [1, 1]} : vector<8x128xf32> to vector<8x64xf32>
    %23 = vector.extract_strided_slice %21 {offsets = [0, 64], sizes = [8, 64], strides = [1, 1]} : vector<8x128xf32> to vector<8x64xf32>
    %24 = vector.extract_strided_slice %15 {offsets = [0, 128], sizes = [8, 64], strides = [1, 1]} : vector<8x256xf32> to vector<8x64xf32>
    %25 = math.tanh %24 : vector<8x64xf32>
    %26 = vector.extract_strided_slice %15 {offsets = [0, 192], sizes = [8, 64], strides = [1, 1]} : vector<8x256xf32> to vector<8x64xf32>
    %27 = arith.negf %26 : vector<8x64xf32>
    %28 = math.exp %27 : vector<8x64xf32>
    %cst_14 = arith.constant 1.000000e+00 : f32
    %29 = vector.broadcast %cst_14 : f32 to vector<8x64xf32>
    %30 = arith.addf %29, %28 : vector<8x64xf32>
    %31 = arith.divf %29, %30 : vector<8x64xf32>
    %32 = arith.mulf %23, %11 : vector<8x64xf32>
    %33 = arith.mulf %22, %25 : vector<8x64xf32>
    %34 = arith.addf %32, %33 : vector<8x64xf32>
    %35 = math.tanh %34 : vector<8x64xf32>
    %36 = arith.mulf %31, %35 : vector<8x64xf32>
    %37 = tpu.iota {dimensions = array<i32: 1>} : vector<1x64xi32>
    %c32_i32 = arith.constant 32 : i32
    %38 = vector.broadcast %c32_i32 : i32 to vector<1x64xi32>
    %39 = arith.cmpi slt, %37, %38 : vector<1x64xi32>
    %40 = vector.shape_cast %39 : vector<1x64xi1> to vector<1x64xi1>
    %41 = vector.broadcast %40 : vector<1x64xi1> to vector<8x64xi1>
    %42 = arith.select %41, %36, %10 : vector<8x64xi1>, vector<8x64xf32>
    %43 = vector.shape_cast %39 : vector<1x64xi1> to vector<1x64xi1>
    %44 = vector.broadcast %43 : vector<1x64xi1> to vector<8x64xi1>
    %45 = arith.select %44, %34, %11 : vector<8x64xi1>, vector<8x64xf32>
    %46 = arith.truncf %42 : vector<8x64xf32> to vector<8x64xbf16>
    %cst_15 = arith.constant dense<0.000000e+00> : vector<8x256xf32>
    %47 = tpu.matmul %46, %9, %cst_15 {dimension_numbers = #tpu.dot_dimension_numbers<[1], [0], [0], [1], [0, 0, 1, 1], [], []>} : vector<8x64xbf16>, vector<64x256xbf16>, vector<8x256xf32> -> vector<8x256xf32>
    %c8 = arith.constant 8 : index
    %c0_16 = arith.constant 0 : index
    %48 = vector.load %arg7[%c8, %c0_16] : memref<128x256xf32, #tpu.memory_space<vmem>>, vector<8x256xf32>
    %49 = arith.addf %47, %48 : vector<8x256xf32>
    %50 = vector.extract_strided_slice %49 {offsets = [0, 0], sizes = [8, 128], strides = [1, 1]} : vector<8x256xf32> to vector<8x128xf32>
    %51 = arith.negf %50 : vector<8x128xf32>
    %52 = math.exp %51 : vector<8x128xf32>
    %cst_17 = arith.constant 1.000000e+00 : f32
    %53 = vector.broadcast %cst_17 : f32 to vector<8x128xf32>
    %54 = arith.addf %53, %52 : vector<8x128xf32>
    %55 = arith.divf %53, %54 : vector<8x128xf32>
    %56 = vector.extract_strided_slice %55 {offsets = [0, 0], sizes = [8, 64], strides = [1, 1]} : vector<8x128xf32> to vector<8x64xf32>
    %57 = vector.extract_strided_slice %55 {offsets = [0, 64], sizes = [8, 64], strides = [1, 1]} : vector<8x128xf32> to vector<8x64xf32>
    %58 = vector.extract_strided_slice %49 {offsets = [0, 128], sizes = [8, 64], strides = [1, 1]} : vector<8x256xf32> to vector<8x64xf32>
    %59 = math.tanh %58 : vector<8x64xf32>
    %60 = vector.extract_strided_slice %49 {offsets = [0, 192], sizes = [8, 64], strides = [1, 1]} : vector<8x256xf32> to vector<8x64xf32>
    %61 = arith.negf %60 : vector<8x64xf32>
    %62 = math.exp %61 : vector<8x64xf32>
    %cst_18 = arith.constant 1.000000e+00 : f32
    %63 = vector.broadcast %cst_18 : f32 to vector<8x64xf32>
    %64 = arith.addf %63, %62 : vector<8x64xf32>
    %65 = arith.divf %63, %64 : vector<8x64xf32>
    %66 = arith.mulf %57, %45 : vector<8x64xf32>
    %67 = arith.mulf %56, %59 : vector<8x64xf32>
    %68 = arith.addf %66, %67 : vector<8x64xf32>
    %69 = math.tanh %68 : vector<8x64xf32>
    %70 = arith.mulf %65, %69 : vector<8x64xf32>
    %71 = arith.truncf %70 : vector<8x64xf32> to vector<8x64xbf16>
    %cst_19 = arith.constant dense<0.000000e+00> : vector<8x256xf32>
    %72 = tpu.matmul %71, %9, %cst_19 {dimension_numbers = #tpu.dot_dimension_numbers<[1], [0], [0], [1], [0, 0, 1, 1], [], []>} : vector<8x64xbf16>, vector<64x256xbf16>, vector<8x256xf32> -> vector<8x256xf32>
    %c16 = arith.constant 16 : index
    %c0_20 = arith.constant 0 : index
    %73 = vector.load %arg7[%c16, %c0_20] : memref<128x256xf32, #tpu.memory_space<vmem>>, vector<8x256xf32>
    %74 = arith.addf %72, %73 : vector<8x256xf32>
    %75 = vector.extract_strided_slice %74 {offsets = [0, 0], sizes = [8, 128], strides = [1, 1]} : vector<8x256xf32> to vector<8x128xf32>
    %76 = arith.negf %75 : vector<8x128xf32>
    %77 = math.exp %76 : vector<8x128xf32>
    %cst_21 = arith.constant 1.000000e+00 : f32
    %78 = vector.broadcast %cst_21 : f32 to vector<8x128xf32>
    %79 = arith.addf %78, %77 : vector<8x128xf32>
    %80 = arith.divf %78, %79 : vector<8x128xf32>
    %81 = vector.extract_strided_slice %80 {offsets = [0, 0], sizes = [8, 64], strides = [1, 1]} : vector<8x128xf32> to vector<8x64xf32>
    %82 = vector.extract_strided_slice %80 {offsets = [0, 64], sizes = [8, 64], strides = [1, 1]} : vector<8x128xf32> to vector<8x64xf32>
    %83 = vector.extract_strided_slice %74 {offsets = [0, 128], sizes = [8, 64], strides = [1, 1]} : vector<8x256xf32> to vector<8x64xf32>
    %84 = math.tanh %83 : vector<8x64xf32>
    %85 = vector.extract_strided_slice %74 {offsets = [0, 192], sizes = [8, 64], strides = [1, 1]} : vector<8x256xf32> to vector<8x64xf32>
    %86 = arith.negf %85 : vector<8x64xf32>
    %87 = math.exp %86 : vector<8x64xf32>
    %cst_22 = arith.constant 1.000000e+00 : f32
    %88 = vector.broadcast %cst_22 : f32 to vector<8x64xf32>
    %89 = arith.addf %88, %87 : vector<8x64xf32>
    %90 = arith.divf %88, %89 : vector<8x64xf32>
    %91 = arith.mulf %82, %68 : vector<8x64xf32>
    %92 = arith.mulf %81, %84 : vector<8x64xf32>
    %93 = arith.addf %91, %92 : vector<8x64xf32>
    %94 = math.tanh %93 : vector<8x64xf32>
    %95 = arith.mulf %90, %94 : vector<8x64xf32>
    %96 = arith.truncf %95 : vector<8x64xf32> to vector<8x64xbf16>
    %cst_23 = arith.constant dense<0.000000e+00> : vector<8x256xf32>
    %97 = tpu.matmul %96, %9, %cst_23 {dimension_numbers = #tpu.dot_dimension_numbers<[1], [0], [0], [1], [0, 0, 1, 1], [], []>} : vector<8x64xbf16>, vector<64x256xbf16>, vector<8x256xf32> -> vector<8x256xf32>
    %c24 = arith.constant 24 : index
    %c0_24 = arith.constant 0 : index
    %98 = vector.load %arg7[%c24, %c0_24] : memref<128x256xf32, #tpu.memory_space<vmem>>, vector<8x256xf32>
    %99 = arith.addf %97, %98 : vector<8x256xf32>
    %100 = vector.extract_strided_slice %99 {offsets = [0, 0], sizes = [8, 128], strides = [1, 1]} : vector<8x256xf32> to vector<8x128xf32>
    %101 = arith.negf %100 : vector<8x128xf32>
    %102 = math.exp %101 : vector<8x128xf32>
    %cst_25 = arith.constant 1.000000e+00 : f32
    %103 = vector.broadcast %cst_25 : f32 to vector<8x128xf32>
    %104 = arith.addf %103, %102 : vector<8x128xf32>
    %105 = arith.divf %103, %104 : vector<8x128xf32>
    %106 = vector.extract_strided_slice %105 {offsets = [0, 0], sizes = [8, 64], strides = [1, 1]} : vector<8x128xf32> to vector<8x64xf32>
    %107 = vector.extract_strided_slice %105 {offsets = [0, 64], sizes = [8, 64], strides = [1, 1]} : vector<8x128xf32> to vector<8x64xf32>
    %108 = vector.extract_strided_slice %99 {offsets = [0, 128], sizes = [8, 64], strides = [1, 1]} : vector<8x256xf32> to vector<8x64xf32>
    %109 = math.tanh %108 : vector<8x64xf32>
    %110 = vector.extract_strided_slice %99 {offsets = [0, 192], sizes = [8, 64], strides = [1, 1]} : vector<8x256xf32> to vector<8x64xf32>
    %111 = arith.negf %110 : vector<8x64xf32>
    %112 = math.exp %111 : vector<8x64xf32>
    %cst_26 = arith.constant 1.000000e+00 : f32
    %113 = vector.broadcast %cst_26 : f32 to vector<8x64xf32>
    %114 = arith.addf %113, %112 : vector<8x64xf32>
    %115 = arith.divf %113, %114 : vector<8x64xf32>
    %116 = arith.mulf %107, %93 : vector<8x64xf32>
    %117 = arith.mulf %106, %109 : vector<8x64xf32>
    %118 = arith.addf %116, %117 : vector<8x64xf32>
    %119 = math.tanh %118 : vector<8x64xf32>
    %120 = arith.mulf %115, %119 : vector<8x64xf32>
    %121 = arith.truncf %120 : vector<8x64xf32> to vector<8x64xbf16>
    %cst_27 = arith.constant dense<0.000000e+00> : vector<8x256xf32>
    %122 = tpu.matmul %121, %9, %cst_27 {dimension_numbers = #tpu.dot_dimension_numbers<[1], [0], [0], [1], [0, 0, 1, 1], [], []>} : vector<8x64xbf16>, vector<64x256xbf16>, vector<8x256xf32> -> vector<8x256xf32>
    %c32 = arith.constant 32 : index
    %c0_28 = arith.constant 0 : index
    %123 = vector.load %arg7[%c32, %c0_28] : memref<128x256xf32, #tpu.memory_space<vmem>>, vector<8x256xf32>
    %124 = arith.addf %122, %123 : vector<8x256xf32>
    %125 = vector.extract_strided_slice %124 {offsets = [0, 0], sizes = [8, 128], strides = [1, 1]} : vector<8x256xf32> to vector<8x128xf32>
    %126 = arith.negf %125 : vector<8x128xf32>
    %127 = math.exp %126 : vector<8x128xf32>
    %cst_29 = arith.constant 1.000000e+00 : f32
    %128 = vector.broadcast %cst_29 : f32 to vector<8x128xf32>
    %129 = arith.addf %128, %127 : vector<8x128xf32>
    %130 = arith.divf %128, %129 : vector<8x128xf32>
    %131 = vector.extract_strided_slice %130 {offsets = [0, 0], sizes = [8, 64], strides = [1, 1]} : vector<8x128xf32> to vector<8x64xf32>
    %132 = vector.extract_strided_slice %130 {offsets = [0, 64], sizes = [8, 64], strides = [1, 1]} : vector<8x128xf32> to vector<8x64xf32>
    %133 = vector.extract_strided_slice %124 {offsets = [0, 128], sizes = [8, 64], strides = [1, 1]} : vector<8x256xf32> to vector<8x64xf32>
    %134 = math.tanh %133 : vector<8x64xf32>
    %135 = vector.extract_strided_slice %124 {offsets = [0, 192], sizes = [8, 64], strides = [1, 1]} : vector<8x256xf32> to vector<8x64xf32>
    %136 = arith.negf %135 : vector<8x64xf32>
    %137 = math.exp %136 : vector<8x64xf32>
    %cst_30 = arith.constant 1.000000e+00 : f32
    %138 = vector.broadcast %cst_30 : f32 to vector<8x64xf32>
    %139 = arith.addf %138, %137 : vector<8x64xf32>
    %140 = arith.divf %138, %139 : vector<8x64xf32>
    %141 = arith.mulf %132, %118 : vector<8x64xf32>
    %142 = arith.mulf %131, %134 : vector<8x64xf32>
    %143 = arith.addf %141, %142 : vector<8x64xf32>
    %144 = math.tanh %143 : vector<8x64xf32>
    %145 = arith.mulf %140, %144 : vector<8x64xf32>
    %146 = arith.truncf %145 : vector<8x64xf32> to vector<8x64xbf16>
    %cst_31 = arith.constant dense<0.000000e+00> : vector<8x256xf32>
    %147 = tpu.matmul %146, %9, %cst_31 {dimension_numbers = #tpu.dot_dimension_numbers<[1], [0], [0], [1], [0, 0, 1, 1], [], []>} : vector<8x64xbf16>, vector<64x256xbf16>, vector<8x256xf32> -> vector<8x256xf32>
    %c40 = arith.constant 40 : index
    %c0_32 = arith.constant 0 : index
    %148 = vector.load %arg7[%c40, %c0_32] : memref<128x256xf32, #tpu.memory_space<vmem>>, vector<8x256xf32>
    %149 = arith.addf %147, %148 : vector<8x256xf32>
    %150 = vector.extract_strided_slice %149 {offsets = [0, 0], sizes = [8, 128], strides = [1, 1]} : vector<8x256xf32> to vector<8x128xf32>
    %151 = arith.negf %150 : vector<8x128xf32>
    %152 = math.exp %151 : vector<8x128xf32>
    %cst_33 = arith.constant 1.000000e+00 : f32
    %153 = vector.broadcast %cst_33 : f32 to vector<8x128xf32>
    %154 = arith.addf %153, %152 : vector<8x128xf32>
    %155 = arith.divf %153, %154 : vector<8x128xf32>
    %156 = vector.extract_strided_slice %155 {offsets = [0, 0], sizes = [8, 64], strides = [1, 1]} : vector<8x128xf32> to vector<8x64xf32>
    %157 = vector.extract_strided_slice %155 {offsets = [0, 64], sizes = [8, 64], strides = [1, 1]} : vector<8x128xf32> to vector<8x64xf32>
    %158 = vector.extract_strided_slice %149 {offsets = [0, 128], sizes = [8, 64], strides = [1, 1]} : vector<8x256xf32> to vector<8x64xf32>
    %159 = math.tanh %158 : vector<8x64xf32>
    %160 = vector.extract_strided_slice %149 {offsets = [0, 192], sizes = [8, 64], strides = [1, 1]} : vector<8x256xf32> to vector<8x64xf32>
    %161 = arith.negf %160 : vector<8x64xf32>
    %162 = math.exp %161 : vector<8x64xf32>
    %cst_34 = arith.constant 1.000000e+00 : f32
    %163 = vector.broadcast %cst_34 : f32 to vector<8x64xf32>
    %164 = arith.addf %163, %162 : vector<8x64xf32>
    %165 = arith.divf %163, %164 : vector<8x64xf32>
    %166 = arith.mulf %157, %143 : vector<8x64xf32>
    %167 = arith.mulf %156, %159 : vector<8x64xf32>
    %168 = arith.addf %166, %167 : vector<8x64xf32>
    %169 = math.tanh %168 : vector<8x64xf32>
    %170 = arith.mulf %165, %169 : vector<8x64xf32>
    %171 = arith.truncf %170 : vector<8x64xf32> to vector<8x64xbf16>
    %cst_35 = arith.constant dense<0.000000e+00> : vector<8x256xf32>
    %172 = tpu.matmul %171, %9, %cst_35 {dimension_numbers = #tpu.dot_dimension_numbers<[1], [0], [0], [1], [0, 0, 1, 1], [], []>} : vector<8x64xbf16>, vector<64x256xbf16>, vector<8x256xf32> -> vector<8x256xf32>
    %c48 = arith.constant 48 : index
    %c0_36 = arith.constant 0 : index
    %173 = vector.load %arg7[%c48, %c0_36] : memref<128x256xf32, #tpu.memory_space<vmem>>, vector<8x256xf32>
    %174 = arith.addf %172, %173 : vector<8x256xf32>
    %175 = vector.extract_strided_slice %174 {offsets = [0, 0], sizes = [8, 128], strides = [1, 1]} : vector<8x256xf32> to vector<8x128xf32>
    %176 = arith.negf %175 : vector<8x128xf32>
    %177 = math.exp %176 : vector<8x128xf32>
    %cst_37 = arith.constant 1.000000e+00 : f32
    %178 = vector.broadcast %cst_37 : f32 to vector<8x128xf32>
    %179 = arith.addf %178, %177 : vector<8x128xf32>
    %180 = arith.divf %178, %179 : vector<8x128xf32>
    %181 = vector.extract_strided_slice %180 {offsets = [0, 0], sizes = [8, 64], strides = [1, 1]} : vector<8x128xf32> to vector<8x64xf32>
    %182 = vector.extract_strided_slice %180 {offsets = [0, 64], sizes = [8, 64], strides = [1, 1]} : vector<8x128xf32> to vector<8x64xf32>
    %183 = vector.extract_strided_slice %174 {offsets = [0, 128], sizes = [8, 64], strides = [1, 1]} : vector<8x256xf32> to vector<8x64xf32>
    %184 = math.tanh %183 : vector<8x64xf32>
    %185 = vector.extract_strided_slice %174 {offsets = [0, 192], sizes = [8, 64], strides = [1, 1]} : vector<8x256xf32> to vector<8x64xf32>
    %186 = arith.negf %185 : vector<8x64xf32>
    %187 = math.exp %186 : vector<8x64xf32>
    %cst_38 = arith.constant 1.000000e+00 : f32
    %188 = vector.broadcast %cst_38 : f32 to vector<8x64xf32>
    %189 = arith.addf %188, %187 : vector<8x64xf32>
    %190 = arith.divf %188, %189 : vector<8x64xf32>
    %191 = arith.mulf %182, %168 : vector<8x64xf32>
    %192 = arith.mulf %181, %184 : vector<8x64xf32>
    %193 = arith.addf %191, %192 : vector<8x64xf32>
    %194 = math.tanh %193 : vector<8x64xf32>
    %195 = arith.mulf %190, %194 : vector<8x64xf32>
    %196 = arith.truncf %195 : vector<8x64xf32> to vector<8x64xbf16>
    %cst_39 = arith.constant dense<0.000000e+00> : vector<8x256xf32>
    %197 = tpu.matmul %196, %9, %cst_39 {dimension_numbers = #tpu.dot_dimension_numbers<[1], [0], [0], [1], [0, 0, 1, 1], [], []>} : vector<8x64xbf16>, vector<64x256xbf16>, vector<8x256xf32> -> vector<8x256xf32>
    %c56 = arith.constant 56 : index
    %c0_40 = arith.constant 0 : index
    %198 = vector.load %arg7[%c56, %c0_40] : memref<128x256xf32, #tpu.memory_space<vmem>>, vector<8x256xf32>
    %199 = arith.addf %197, %198 : vector<8x256xf32>
    %200 = vector.extract_strided_slice %199 {offsets = [0, 0], sizes = [8, 128], strides = [1, 1]} : vector<8x256xf32> to vector<8x128xf32>
    %201 = arith.negf %200 : vector<8x128xf32>
    %202 = math.exp %201 : vector<8x128xf32>
    %cst_41 = arith.constant 1.000000e+00 : f32
    %203 = vector.broadcast %cst_41 : f32 to vector<8x128xf32>
    %204 = arith.addf %203, %202 : vector<8x128xf32>
    %205 = arith.divf %203, %204 : vector<8x128xf32>
    %206 = vector.extract_strided_slice %205 {offsets = [0, 0], sizes = [8, 64], strides = [1, 1]} : vector<8x128xf32> to vector<8x64xf32>
    %207 = vector.extract_strided_slice %205 {offsets = [0, 64], sizes = [8, 64], strides = [1, 1]} : vector<8x128xf32> to vector<8x64xf32>
    %208 = vector.extract_strided_slice %199 {offsets = [0, 128], sizes = [8, 64], strides = [1, 1]} : vector<8x256xf32> to vector<8x64xf32>
    %209 = math.tanh %208 : vector<8x64xf32>
    %210 = vector.extract_strided_slice %199 {offsets = [0, 192], sizes = [8, 64], strides = [1, 1]} : vector<8x256xf32> to vector<8x64xf32>
    %211 = arith.negf %210 : vector<8x64xf32>
    %212 = math.exp %211 : vector<8x64xf32>
    %cst_42 = arith.constant 1.000000e+00 : f32
    %213 = vector.broadcast %cst_42 : f32 to vector<8x64xf32>
    %214 = arith.addf %213, %212 : vector<8x64xf32>
    %215 = arith.divf %213, %214 : vector<8x64xf32>
    %216 = arith.mulf %207, %193 : vector<8x64xf32>
    %217 = arith.mulf %206, %209 : vector<8x64xf32>
    %218 = arith.addf %216, %217 : vector<8x64xf32>
    %219 = math.tanh %218 : vector<8x64xf32>
    %220 = arith.mulf %215, %219 : vector<8x64xf32>
    %221 = arith.truncf %220 : vector<8x64xf32> to vector<8x64xbf16>
    %cst_43 = arith.constant dense<0.000000e+00> : vector<8x256xf32>
    %222 = tpu.matmul %221, %9, %cst_43 {dimension_numbers = #tpu.dot_dimension_numbers<[1], [0], [0], [1], [0, 0, 1, 1], [], []>} : vector<8x64xbf16>, vector<64x256xbf16>, vector<8x256xf32> -> vector<8x256xf32>
    %c64 = arith.constant 64 : index
    %c0_44 = arith.constant 0 : index
    %223 = vector.load %arg7[%c64, %c0_44] : memref<128x256xf32, #tpu.memory_space<vmem>>, vector<8x256xf32>
    %224 = arith.addf %222, %223 : vector<8x256xf32>
    %225 = vector.extract_strided_slice %224 {offsets = [0, 0], sizes = [8, 128], strides = [1, 1]} : vector<8x256xf32> to vector<8x128xf32>
    %226 = arith.negf %225 : vector<8x128xf32>
    %227 = math.exp %226 : vector<8x128xf32>
    %cst_45 = arith.constant 1.000000e+00 : f32
    %228 = vector.broadcast %cst_45 : f32 to vector<8x128xf32>
    %229 = arith.addf %228, %227 : vector<8x128xf32>
    %230 = arith.divf %228, %229 : vector<8x128xf32>
    %231 = vector.extract_strided_slice %230 {offsets = [0, 0], sizes = [8, 64], strides = [1, 1]} : vector<8x128xf32> to vector<8x64xf32>
    %232 = vector.extract_strided_slice %230 {offsets = [0, 64], sizes = [8, 64], strides = [1, 1]} : vector<8x128xf32> to vector<8x64xf32>
    %233 = vector.extract_strided_slice %224 {offsets = [0, 128], sizes = [8, 64], strides = [1, 1]} : vector<8x256xf32> to vector<8x64xf32>
    %234 = math.tanh %233 : vector<8x64xf32>
    %235 = vector.extract_strided_slice %224 {offsets = [0, 192], sizes = [8, 64], strides = [1, 1]} : vector<8x256xf32> to vector<8x64xf32>
    %236 = arith.negf %235 : vector<8x64xf32>
    %237 = math.exp %236 : vector<8x64xf32>
    %cst_46 = arith.constant 1.000000e+00 : f32
    %238 = vector.broadcast %cst_46 : f32 to vector<8x64xf32>
    %239 = arith.addf %238, %237 : vector<8x64xf32>
    %240 = arith.divf %238, %239 : vector<8x64xf32>
    %241 = arith.mulf %232, %218 : vector<8x64xf32>
    %242 = arith.mulf %231, %234 : vector<8x64xf32>
    %243 = arith.addf %241, %242 : vector<8x64xf32>
    %244 = math.tanh %243 : vector<8x64xf32>
    %245 = arith.mulf %240, %244 : vector<8x64xf32>
    %246 = arith.truncf %245 : vector<8x64xf32> to vector<8x64xbf16>
    %cst_47 = arith.constant dense<0.000000e+00> : vector<8x256xf32>
    %247 = tpu.matmul %246, %9, %cst_47 {dimension_numbers = #tpu.dot_dimension_numbers<[1], [0], [0], [1], [0, 0, 1, 1], [], []>} : vector<8x64xbf16>, vector<64x256xbf16>, vector<8x256xf32> -> vector<8x256xf32>
    %c72 = arith.constant 72 : index
    %c0_48 = arith.constant 0 : index
    %248 = vector.load %arg7[%c72, %c0_48] : memref<128x256xf32, #tpu.memory_space<vmem>>, vector<8x256xf32>
    %249 = arith.addf %247, %248 : vector<8x256xf32>
    %250 = vector.extract_strided_slice %249 {offsets = [0, 0], sizes = [8, 128], strides = [1, 1]} : vector<8x256xf32> to vector<8x128xf32>
    %251 = arith.negf %250 : vector<8x128xf32>
    %252 = math.exp %251 : vector<8x128xf32>
    %cst_49 = arith.constant 1.000000e+00 : f32
    %253 = vector.broadcast %cst_49 : f32 to vector<8x128xf32>
    %254 = arith.addf %253, %252 : vector<8x128xf32>
    %255 = arith.divf %253, %254 : vector<8x128xf32>
    %256 = vector.extract_strided_slice %255 {offsets = [0, 0], sizes = [8, 64], strides = [1, 1]} : vector<8x128xf32> to vector<8x64xf32>
    %257 = vector.extract_strided_slice %255 {offsets = [0, 64], sizes = [8, 64], strides = [1, 1]} : vector<8x128xf32> to vector<8x64xf32>
    %258 = vector.extract_strided_slice %249 {offsets = [0, 128], sizes = [8, 64], strides = [1, 1]} : vector<8x256xf32> to vector<8x64xf32>
    %259 = math.tanh %258 : vector<8x64xf32>
    %260 = vector.extract_strided_slice %249 {offsets = [0, 192], sizes = [8, 64], strides = [1, 1]} : vector<8x256xf32> to vector<8x64xf32>
    %261 = arith.negf %260 : vector<8x64xf32>
    %262 = math.exp %261 : vector<8x64xf32>
    %cst_50 = arith.constant 1.000000e+00 : f32
    %263 = vector.broadcast %cst_50 : f32 to vector<8x64xf32>
    %264 = arith.addf %263, %262 : vector<8x64xf32>
    %265 = arith.divf %263, %264 : vector<8x64xf32>
    %266 = arith.mulf %257, %243 : vector<8x64xf32>
    %267 = arith.mulf %256, %259 : vector<8x64xf32>
    %268 = arith.addf %266, %267 : vector<8x64xf32>
    %269 = math.tanh %268 : vector<8x64xf32>
    %270 = arith.mulf %265, %269 : vector<8x64xf32>
    %271 = arith.truncf %270 : vector<8x64xf32> to vector<8x64xbf16>
    %cst_51 = arith.constant dense<0.000000e+00> : vector<8x256xf32>
    %272 = tpu.matmul %271, %9, %cst_51 {dimension_numbers = #tpu.dot_dimension_numbers<[1], [0], [0], [1], [0, 0, 1, 1], [], []>} : vector<8x64xbf16>, vector<64x256xbf16>, vector<8x256xf32> -> vector<8x256xf32>
    %c80 = arith.constant 80 : index
    %c0_52 = arith.constant 0 : index
    %273 = vector.load %arg7[%c80, %c0_52] : memref<128x256xf32, #tpu.memory_space<vmem>>, vector<8x256xf32>
    %274 = arith.addf %272, %273 : vector<8x256xf32>
    %275 = vector.extract_strided_slice %274 {offsets = [0, 0], sizes = [8, 128], strides = [1, 1]} : vector<8x256xf32> to vector<8x128xf32>
    %276 = arith.negf %275 : vector<8x128xf32>
    %277 = math.exp %276 : vector<8x128xf32>
    %cst_53 = arith.constant 1.000000e+00 : f32
    %278 = vector.broadcast %cst_53 : f32 to vector<8x128xf32>
    %279 = arith.addf %278, %277 : vector<8x128xf32>
    %280 = arith.divf %278, %279 : vector<8x128xf32>
    %281 = vector.extract_strided_slice %280 {offsets = [0, 0], sizes = [8, 64], strides = [1, 1]} : vector<8x128xf32> to vector<8x64xf32>
    %282 = vector.extract_strided_slice %280 {offsets = [0, 64], sizes = [8, 64], strides = [1, 1]} : vector<8x128xf32> to vector<8x64xf32>
    %283 = vector.extract_strided_slice %274 {offsets = [0, 128], sizes = [8, 64], strides = [1, 1]} : vector<8x256xf32> to vector<8x64xf32>
    %284 = math.tanh %283 : vector<8x64xf32>
    %285 = vector.extract_strided_slice %274 {offsets = [0, 192], sizes = [8, 64], strides = [1, 1]} : vector<8x256xf32> to vector<8x64xf32>
    %286 = arith.negf %285 : vector<8x64xf32>
    %287 = math.exp %286 : vector<8x64xf32>
    %cst_54 = arith.constant 1.000000e+00 : f32
    %288 = vector.broadcast %cst_54 : f32 to vector<8x64xf32>
    %289 = arith.addf %288, %287 : vector<8x64xf32>
    %290 = arith.divf %288, %289 : vector<8x64xf32>
    %291 = arith.mulf %282, %268 : vector<8x64xf32>
    %292 = arith.mulf %281, %284 : vector<8x64xf32>
    %293 = arith.addf %291, %292 : vector<8x64xf32>
    %294 = math.tanh %293 : vector<8x64xf32>
    %295 = arith.mulf %290, %294 : vector<8x64xf32>
    %296 = arith.truncf %295 : vector<8x64xf32> to vector<8x64xbf16>
    %cst_55 = arith.constant dense<0.000000e+00> : vector<8x256xf32>
    %297 = tpu.matmul %296, %9, %cst_55 {dimension_numbers = #tpu.dot_dimension_numbers<[1], [0], [0], [1], [0, 0, 1, 1], [], []>} : vector<8x64xbf16>, vector<64x256xbf16>, vector<8x256xf32> -> vector<8x256xf32>
    %c88 = arith.constant 88 : index
    %c0_56 = arith.constant 0 : index
    %298 = vector.load %arg7[%c88, %c0_56] : memref<128x256xf32, #tpu.memory_space<vmem>>, vector<8x256xf32>
    %299 = arith.addf %297, %298 : vector<8x256xf32>
    %300 = vector.extract_strided_slice %299 {offsets = [0, 0], sizes = [8, 128], strides = [1, 1]} : vector<8x256xf32> to vector<8x128xf32>
    %301 = arith.negf %300 : vector<8x128xf32>
    %302 = math.exp %301 : vector<8x128xf32>
    %cst_57 = arith.constant 1.000000e+00 : f32
    %303 = vector.broadcast %cst_57 : f32 to vector<8x128xf32>
    %304 = arith.addf %303, %302 : vector<8x128xf32>
    %305 = arith.divf %303, %304 : vector<8x128xf32>
    %306 = vector.extract_strided_slice %305 {offsets = [0, 0], sizes = [8, 64], strides = [1, 1]} : vector<8x128xf32> to vector<8x64xf32>
    %307 = vector.extract_strided_slice %305 {offsets = [0, 64], sizes = [8, 64], strides = [1, 1]} : vector<8x128xf32> to vector<8x64xf32>
    %308 = vector.extract_strided_slice %299 {offsets = [0, 128], sizes = [8, 64], strides = [1, 1]} : vector<8x256xf32> to vector<8x64xf32>
    %309 = math.tanh %308 : vector<8x64xf32>
    %310 = vector.extract_strided_slice %299 {offsets = [0, 192], sizes = [8, 64], strides = [1, 1]} : vector<8x256xf32> to vector<8x64xf32>
    %311 = arith.negf %310 : vector<8x64xf32>
    %312 = math.exp %311 : vector<8x64xf32>
    %cst_58 = arith.constant 1.000000e+00 : f32
    %313 = vector.broadcast %cst_58 : f32 to vector<8x64xf32>
    %314 = arith.addf %313, %312 : vector<8x64xf32>
    %315 = arith.divf %313, %314 : vector<8x64xf32>
    %316 = arith.mulf %307, %293 : vector<8x64xf32>
    %317 = arith.mulf %306, %309 : vector<8x64xf32>
    %318 = arith.addf %316, %317 : vector<8x64xf32>
    %319 = math.tanh %318 : vector<8x64xf32>
    %320 = arith.mulf %315, %319 : vector<8x64xf32>
    %321 = arith.truncf %320 : vector<8x64xf32> to vector<8x64xbf16>
    %cst_59 = arith.constant dense<0.000000e+00> : vector<8x256xf32>
    %322 = tpu.matmul %321, %9, %cst_59 {dimension_numbers = #tpu.dot_dimension_numbers<[1], [0], [0], [1], [0, 0, 1, 1], [], []>} : vector<8x64xbf16>, vector<64x256xbf16>, vector<8x256xf32> -> vector<8x256xf32>
    %c96 = arith.constant 96 : index
    %c0_60 = arith.constant 0 : index
    %323 = vector.load %arg7[%c96, %c0_60] : memref<128x256xf32, #tpu.memory_space<vmem>>, vector<8x256xf32>
    %324 = arith.addf %322, %323 : vector<8x256xf32>
    %325 = vector.extract_strided_slice %324 {offsets = [0, 0], sizes = [8, 128], strides = [1, 1]} : vector<8x256xf32> to vector<8x128xf32>
    %326 = arith.negf %325 : vector<8x128xf32>
    %327 = math.exp %326 : vector<8x128xf32>
    %cst_61 = arith.constant 1.000000e+00 : f32
    %328 = vector.broadcast %cst_61 : f32 to vector<8x128xf32>
    %329 = arith.addf %328, %327 : vector<8x128xf32>
    %330 = arith.divf %328, %329 : vector<8x128xf32>
    %331 = vector.extract_strided_slice %330 {offsets = [0, 0], sizes = [8, 64], strides = [1, 1]} : vector<8x128xf32> to vector<8x64xf32>
    %332 = vector.extract_strided_slice %330 {offsets = [0, 64], sizes = [8, 64], strides = [1, 1]} : vector<8x128xf32> to vector<8x64xf32>
    %333 = vector.extract_strided_slice %324 {offsets = [0, 128], sizes = [8, 64], strides = [1, 1]} : vector<8x256xf32> to vector<8x64xf32>
    %334 = math.tanh %333 : vector<8x64xf32>
    %335 = vector.extract_strided_slice %324 {offsets = [0, 192], sizes = [8, 64], strides = [1, 1]} : vector<8x256xf32> to vector<8x64xf32>
    %336 = arith.negf %335 : vector<8x64xf32>
    %337 = math.exp %336 : vector<8x64xf32>
    %cst_62 = arith.constant 1.000000e+00 : f32
    %338 = vector.broadcast %cst_62 : f32 to vector<8x64xf32>
    %339 = arith.addf %338, %337 : vector<8x64xf32>
    %340 = arith.divf %338, %339 : vector<8x64xf32>
    %341 = arith.mulf %332, %318 : vector<8x64xf32>
    %342 = arith.mulf %331, %334 : vector<8x64xf32>
    %343 = arith.addf %341, %342 : vector<8x64xf32>
    %344 = math.tanh %343 : vector<8x64xf32>
    %345 = arith.mulf %340, %344 : vector<8x64xf32>
    %346 = arith.truncf %345 : vector<8x64xf32> to vector<8x64xbf16>
    %cst_63 = arith.constant dense<0.000000e+00> : vector<8x256xf32>
    %347 = tpu.matmul %346, %9, %cst_63 {dimension_numbers = #tpu.dot_dimension_numbers<[1], [0], [0], [1], [0, 0, 1, 1], [], []>} : vector<8x64xbf16>, vector<64x256xbf16>, vector<8x256xf32> -> vector<8x256xf32>
    %c104 = arith.constant 104 : index
    %c0_64 = arith.constant 0 : index
    %348 = vector.load %arg7[%c104, %c0_64] : memref<128x256xf32, #tpu.memory_space<vmem>>, vector<8x256xf32>
    %349 = arith.addf %347, %348 : vector<8x256xf32>
    %350 = vector.extract_strided_slice %349 {offsets = [0, 0], sizes = [8, 128], strides = [1, 1]} : vector<8x256xf32> to vector<8x128xf32>
    %351 = arith.negf %350 : vector<8x128xf32>
    %352 = math.exp %351 : vector<8x128xf32>
    %cst_65 = arith.constant 1.000000e+00 : f32
    %353 = vector.broadcast %cst_65 : f32 to vector<8x128xf32>
    %354 = arith.addf %353, %352 : vector<8x128xf32>
    %355 = arith.divf %353, %354 : vector<8x128xf32>
    %356 = vector.extract_strided_slice %355 {offsets = [0, 0], sizes = [8, 64], strides = [1, 1]} : vector<8x128xf32> to vector<8x64xf32>
    %357 = vector.extract_strided_slice %355 {offsets = [0, 64], sizes = [8, 64], strides = [1, 1]} : vector<8x128xf32> to vector<8x64xf32>
    %358 = vector.extract_strided_slice %349 {offsets = [0, 128], sizes = [8, 64], strides = [1, 1]} : vector<8x256xf32> to vector<8x64xf32>
    %359 = math.tanh %358 : vector<8x64xf32>
    %360 = vector.extract_strided_slice %349 {offsets = [0, 192], sizes = [8, 64], strides = [1, 1]} : vector<8x256xf32> to vector<8x64xf32>
    %361 = arith.negf %360 : vector<8x64xf32>
    %362 = math.exp %361 : vector<8x64xf32>
    %cst_66 = arith.constant 1.000000e+00 : f32
    %363 = vector.broadcast %cst_66 : f32 to vector<8x64xf32>
    %364 = arith.addf %363, %362 : vector<8x64xf32>
    %365 = arith.divf %363, %364 : vector<8x64xf32>
    %366 = arith.mulf %357, %343 : vector<8x64xf32>
    %367 = arith.mulf %356, %359 : vector<8x64xf32>
    %368 = arith.addf %366, %367 : vector<8x64xf32>
    %369 = math.tanh %368 : vector<8x64xf32>
    %370 = arith.mulf %365, %369 : vector<8x64xf32>
    %371 = arith.truncf %370 : vector<8x64xf32> to vector<8x64xbf16>
    %cst_67 = arith.constant dense<0.000000e+00> : vector<8x256xf32>
    %372 = tpu.matmul %371, %9, %cst_67 {dimension_numbers = #tpu.dot_dimension_numbers<[1], [0], [0], [1], [0, 0, 1, 1], [], []>} : vector<8x64xbf16>, vector<64x256xbf16>, vector<8x256xf32> -> vector<8x256xf32>
    %c112 = arith.constant 112 : index
    %c0_68 = arith.constant 0 : index
    %373 = vector.load %arg7[%c112, %c0_68] : memref<128x256xf32, #tpu.memory_space<vmem>>, vector<8x256xf32>
    %374 = arith.addf %372, %373 : vector<8x256xf32>
    %375 = vector.extract_strided_slice %374 {offsets = [0, 0], sizes = [8, 128], strides = [1, 1]} : vector<8x256xf32> to vector<8x128xf32>
    %376 = arith.negf %375 : vector<8x128xf32>
    %377 = math.exp %376 : vector<8x128xf32>
    %cst_69 = arith.constant 1.000000e+00 : f32
    %378 = vector.broadcast %cst_69 : f32 to vector<8x128xf32>
    %379 = arith.addf %378, %377 : vector<8x128xf32>
    %380 = arith.divf %378, %379 : vector<8x128xf32>
    %381 = vector.extract_strided_slice %380 {offsets = [0, 0], sizes = [8, 64], strides = [1, 1]} : vector<8x128xf32> to vector<8x64xf32>
    %382 = vector.extract_strided_slice %380 {offsets = [0, 64], sizes = [8, 64], strides = [1, 1]} : vector<8x128xf32> to vector<8x64xf32>
    %383 = vector.extract_strided_slice %374 {offsets = [0, 128], sizes = [8, 64], strides = [1, 1]} : vector<8x256xf32> to vector<8x64xf32>
    %384 = math.tanh %383 : vector<8x64xf32>
    %385 = vector.extract_strided_slice %374 {offsets = [0, 192], sizes = [8, 64], strides = [1, 1]} : vector<8x256xf32> to vector<8x64xf32>
    %386 = arith.negf %385 : vector<8x64xf32>
    %387 = math.exp %386 : vector<8x64xf32>
    %cst_70 = arith.constant 1.000000e+00 : f32
    %388 = vector.broadcast %cst_70 : f32 to vector<8x64xf32>
    %389 = arith.addf %388, %387 : vector<8x64xf32>
    %390 = arith.divf %388, %389 : vector<8x64xf32>
    %391 = arith.mulf %382, %368 : vector<8x64xf32>
    %392 = arith.mulf %381, %384 : vector<8x64xf32>
    %393 = arith.addf %391, %392 : vector<8x64xf32>
    %394 = math.tanh %393 : vector<8x64xf32>
    %395 = arith.mulf %390, %394 : vector<8x64xf32>
    %396 = arith.truncf %395 : vector<8x64xf32> to vector<8x64xbf16>
    %cst_71 = arith.constant dense<0.000000e+00> : vector<8x256xf32>
    %397 = tpu.matmul %396, %9, %cst_71 {dimension_numbers = #tpu.dot_dimension_numbers<[1], [0], [0], [1], [0, 0, 1, 1], [], []>} : vector<8x64xbf16>, vector<64x256xbf16>, vector<8x256xf32> -> vector<8x256xf32>
    %c120 = arith.constant 120 : index
    %c0_72 = arith.constant 0 : index
    %398 = vector.load %arg7[%c120, %c0_72] : memref<128x256xf32, #tpu.memory_space<vmem>>, vector<8x256xf32>
    %399 = arith.addf %397, %398 : vector<8x256xf32>
    %400 = vector.extract_strided_slice %399 {offsets = [0, 0], sizes = [8, 128], strides = [1, 1]} : vector<8x256xf32> to vector<8x128xf32>
    %401 = arith.negf %400 : vector<8x128xf32>
    %402 = math.exp %401 : vector<8x128xf32>
    %cst_73 = arith.constant 1.000000e+00 : f32
    %403 = vector.broadcast %cst_73 : f32 to vector<8x128xf32>
    %404 = arith.addf %403, %402 : vector<8x128xf32>
    %405 = arith.divf %403, %404 : vector<8x128xf32>
    %406 = vector.extract_strided_slice %405 {offsets = [0, 0], sizes = [8, 64], strides = [1, 1]} : vector<8x128xf32> to vector<8x64xf32>
    %407 = vector.extract_strided_slice %405 {offsets = [0, 64], sizes = [8, 64], strides = [1, 1]} : vector<8x128xf32> to vector<8x64xf32>
    %408 = vector.extract_strided_slice %399 {offsets = [0, 128], sizes = [8, 64], strides = [1, 1]} : vector<8x256xf32> to vector<8x64xf32>
    %409 = math.tanh %408 : vector<8x64xf32>
    %410 = vector.extract_strided_slice %399 {offsets = [0, 192], sizes = [8, 64], strides = [1, 1]} : vector<8x256xf32> to vector<8x64xf32>
    %411 = arith.negf %410 : vector<8x64xf32>
    %412 = math.exp %411 : vector<8x64xf32>
    %cst_74 = arith.constant 1.000000e+00 : f32
    %413 = vector.broadcast %cst_74 : f32 to vector<8x64xf32>
    %414 = arith.addf %413, %412 : vector<8x64xf32>
    %415 = arith.divf %413, %414 : vector<8x64xf32>
    %416 = arith.mulf %407, %393 : vector<8x64xf32>
    %417 = arith.mulf %406, %409 : vector<8x64xf32>
    %418 = arith.addf %416, %417 : vector<8x64xf32>
    %419 = math.tanh %418 : vector<8x64xf32>
    %420 = arith.mulf %415, %419 : vector<8x64xf32>
    %421 = arith.truncf %420 : vector<8x64xf32> to vector<8x64xbf16>
    %cst_75 = arith.constant dense<0.000000e+00> : vector<8x256xf32>
    %422 = tpu.matmul %421, %9, %cst_75 {dimension_numbers = #tpu.dot_dimension_numbers<[1], [0], [0], [1], [0, 0, 1, 1], [], []>} : vector<8x64xbf16>, vector<64x256xbf16>, vector<8x256xf32> -> vector<8x256xf32>
    %c120_76 = arith.constant 120 : index
    %c0_77 = arith.constant 0 : index
    %423 = vector.load %arg7[%c120_76, %c0_77] : memref<128x256xf32, #tpu.memory_space<vmem>>, vector<8x256xf32>
    %424 = arith.addf %422, %423 : vector<8x256xf32>
    %425 = vector.extract_strided_slice %424 {offsets = [0, 0], sizes = [8, 128], strides = [1, 1]} : vector<8x256xf32> to vector<8x128xf32>
    %426 = arith.negf %425 : vector<8x128xf32>
    %427 = math.exp %426 : vector<8x128xf32>
    %cst_78 = arith.constant 1.000000e+00 : f32
    %428 = vector.broadcast %cst_78 : f32 to vector<8x128xf32>
    %429 = arith.addf %428, %427 : vector<8x128xf32>
    %430 = arith.divf %428, %429 : vector<8x128xf32>
    %431 = vector.extract_strided_slice %430 {offsets = [0, 0], sizes = [8, 64], strides = [1, 1]} : vector<8x128xf32> to vector<8x64xf32>
    %432 = vector.extract_strided_slice %430 {offsets = [0, 64], sizes = [8, 64], strides = [1, 1]} : vector<8x128xf32> to vector<8x64xf32>
    %433 = vector.extract_strided_slice %424 {offsets = [0, 128], sizes = [8, 64], strides = [1, 1]} : vector<8x256xf32> to vector<8x64xf32>
    %434 = math.tanh %433 : vector<8x64xf32>
    %435 = vector.extract_strided_slice %424 {offsets = [0, 192], sizes = [8, 64], strides = [1, 1]} : vector<8x256xf32> to vector<8x64xf32>
    %436 = arith.negf %435 : vector<8x64xf32>
    %437 = math.exp %436 : vector<8x64xf32>
    %cst_79 = arith.constant 1.000000e+00 : f32
    %438 = vector.broadcast %cst_79 : f32 to vector<8x64xf32>
    %439 = arith.addf %438, %437 : vector<8x64xf32>
    %440 = arith.divf %438, %439 : vector<8x64xf32>
    %441 = arith.mulf %432, %418 : vector<8x64xf32>
    %442 = arith.mulf %431, %434 : vector<8x64xf32>
    %443 = arith.addf %441, %442 : vector<8x64xf32>
    %444 = math.tanh %443 : vector<8x64xf32>
    %445 = arith.mulf %440, %444 : vector<8x64xf32>
    %446 = arith.truncf %445 : vector<8x64xf32> to vector<8x64xbf16>
    %c0_80 = arith.constant 0 : index
    %c0_81 = arith.constant 0 : index
    %447 = vector.load %arg4[%c0_80, %c0_81] : memref<64x128xbf16, #tpu.memory_space<vmem>>, vector<64x128xbf16>
    %cst_82 = arith.constant dense<0.000000e+00> : vector<8x128xf32>
    %448 = tpu.matmul %446, %447, %cst_82 {dimension_numbers = #tpu.dot_dimension_numbers<[1], [0], [0], [1], [0, 0, 1, 1], [], []>} : vector<8x64xbf16>, vector<64x128xbf16>, vector<8x128xf32> -> vector<8x128xf32>
    %c0_83 = arith.constant 0 : index
    %c0_84 = arith.constant 0 : index
    %449 = vector.load %arg5[%c0_83, %c0_84] : memref<1x128xf32, #tpu.memory_space<vmem>>, vector<1x128xf32>
    %450 = vector.broadcast %449 : vector<1x128xf32> to vector<8x128xf32>
    %451 = arith.addf %448, %450 : vector<8x128xf32>
    %c0_85 = arith.constant 0 : index
    %c0_86 = arith.constant 0 : index
    %452 = vector.load %arg6[%c0_85, %c0_86] : memref<8x128xf32, #tpu.memory_space<vmem>>, vector<8x128xf32>
    tpu.vector_store %arg6[%c0_85, %c0_86], %451 {strides = array<i32>} : memref<8x128xf32, #tpu.memory_space<vmem>>, vector<8x128xf32>,
    return
  }
}

</mosaic_0001>

<bundles_post_ra>
// kernel: tpu_custom_call.1
= control target key start
LH: loop header
LB: loop body
LE: loop exit
PB: predicated region body
PF: predicated region fallthrough
CT: control target
= control target key end

     0   :  { %v1965_v2 = vmov 0   ;;  %s2447_s0 = inlined_call_operand.vmem [shape: f32[128,1], index: 0, kind: input, shape index: {}]   ;;  %s2448_s1 = inlined_call_operand.vmem [shape: f32[1,256], index: 1, kind: input, shape index: {}]   ;;  %s2449_s2 = inlined_call_operand.vmem [shape: f32[1,256], index: 2, kind: input, shape index: {}]   ;;  %s2450_s3 = inlined_call_operand.vmem [shape: bf16[64,256], index: 3, kind: input, shape index: {}]   ;;  %s2451_s4 = inlined_call_operand.vmem [shape: bf16[64,128], index: 4, kind: input, shape index: {}]   ;;  %s2452_s5 = inlined_call_operand.vmem [shape: f32[1,128], index: 5, kind: input, shape index: {}]   ;;  %s2453_s6 = inlined_call_operand.hbm [shape: f32[8,128], index: 6, kind: output, shape index: {}]  }
   0x1   :  { %v2008_v0 = vld [vmem:[%s2450_s3 + $0x4] ss:$8 sps:$4 sm:$0xff]   ;;  %v2013_v1 = vld [vmem:[%s2450_s3] ss:$8 sps:$4 sm:$0xff]   ;;  %327 = vmatprep.mubr.bf16.mxu0 %v1965_v2  ;;  %1711 = vset.pattern.permute.xlu0 %v1965_v2  ;;  %v2021_v3 = vld [vmem:[%s2450_s3 + $0x14] ss:$8 sps:$4 sm:$0xff]  }
   0x2   :  { %295 = vmatprep.subr.bf16.mxu0 %v2008_v0  ;;  %1712 = vset.pattern.permute.xlu1 %v1965_v2  ;;  %v2028_v4 = vld [vmem:[%s2450_s3 + $0x10] ss:$8 sps:$4 sm:$0xff]   ;;  %v2035_v5 = vld [vmem:[%s2450_s3 + $0x24] ss:$8 sps:$4 sm:$0xff]   ;;  %v2041_v6 = vld [vmem:[%s2450_s3 + $0x20] ss:$8 sps:$4 sm:$0xff]  }
   0x3   :  { %296 = vmatpush1.bf16.msra.mxu0 %v2013_v1  ;;  %379 = vmatprep.subr.bf16.mxu1 %v2008_v0  ;;  %v25_v7 = vld [vmem:[%s2447_s0] sm:$0xff]  ;;  %v2051_v8 = vld [vmem:[%s2450_s3 + $0x34] ss:$8 sps:$4 sm:$0xff]  }
   0x4   :  { %297 = vmatprep.subr.bf16.mxu0 %v2021_v3  ;;  %380 = vmatpush1.bf16.msra.mxu1 %v2013_v1 }
   0x5   :  { %381 = vmatprep.subr.bf16.mxu1 %v2021_v3  ;;  %411 = vmatprep.mubr.bf16.mxu1 %v1965_v2 }
   0x6   :  { %44 = vperm.xlu0 %1711, %v25_v7  }
   0x7   :  { %298 = vmatpush1.bf16.msra.mxu0 %v2028_v4 }
   0x8   :  { %299 = vmatprep.subr.bf16.mxu0 %v2035_v5  ;;  %382 = vmatpush1.bf16.msra.mxu1 %v2028_v4 }
   0x9   :  { %383 = vmatprep.subr.bf16.mxu1 %v2035_v5 }
   0xa   :  { %11 = vsyncpa [#allocation4], 0  ;;  %v2061_v9 = vld [vmem:[%s2450_s3 + $0x30] ss:$8 sps:$4 sm:$0xff]   ;;  %v123_v10 = vlaneseq  ;;  %v41_v13 = vld [vmem:[%s2448_s1] sm:$0x3] }
   0xb   :  { %300 = vmatpush1.bf16.msra.mxu0 %v2041_v6  ;;  %v165_v16 = vld [vmem:[%s2449_s2] sm:$0x3]  ;;  %s1966_s1 = smov 64   ;;  %v26_v46 = vld [vmem:[%s2447_s0 + $0x8] sm:$0xff]  ;;  %vm291_vm1 = vcmask 523264   ;;  %vm1968_vm2 = vmmov 0  }
   0xc   :  { %301 = vmatprep.subr.bf16.mxu0 %v2051_v8  ;;  %384 = vmatpush1.bf16.msra.mxu1 %v2041_v6  ;;  %v124_v11 = vshrl.u32 %v123_v10, 7  ;;  %v359_v47 = vand.u32 127, %v123_v10  ;;  %s1969_s21 = smov [#allocation3]  }
   0xd   :  { %385 = vmatprep.subr.bf16.mxu1 %v2051_v8  ;;  %s1617_s22 = sshll.u32 %s1969_s21, 4  ;;  %s1618_s22 = int_to_ptr.vmem [resolvable:$true] %s1617_s22 }
   0xe   :  { %v125_v12 = vsub.s32 0, %v124_v11  ;;  %v129_v19 = vsub.s32 1, %v124_v11  ;;  %vm360_vm0 = vcmp.lt.s32.totalorder %v359_v47, 32  ;;  %s1941_s23 = scalar_lea.vmem %s1618_s22, 128  ;;  %p1946_p1 = scmp.lt.s32.totalorder %s1618_s22, %s1618_s22 }
   0xf   :  { %302 = vmatpush1.bf16.msra.mxu0 %v2061_v9  ;;  %p1942_p0 = scmp.ne.s32.totalorder %s1618_s22, %s1941_s23  ;;  %p1947_p2 = scmp.lt.s32.totalorder %s1941_s23, %s1941_s23 }
  0x10   :  { %386 = vmatpush1.bf16.msra.mxu1 %v2061_v9  ;;  %455 = vmatprep.subr.bf16.mxu0 %v2008_v0  ;;  %v2083_v14 = vrot.slane %v41_v13, %v125_v12  ;;  %v2089_v18 = vrot.slane %v165_v16, %v125_v12  ;;  %v2092_v22 = vrot.slane %v41_v13, %v129_v19 }
  0x11   :  { %527 = vmatprep.subr.bf16.mxu1 %v2008_v0  ;;  %v2095_v29 = vrot.slane %v165_v16, %v129_v19  ;;  %v27_v16 = vld [vmem:[%s2447_s0 + $0x10] sm:$0xff]  ;;  %p1948_p3 = por %p1947_p2, %p1946_p1 }
  0x12   :  { %328 = vmatmul.mubr.bf16.vlgmr.msra.gmra.mrb[0].mxu0 %v1965_v2 }
  0x13   :  { %456 = vmatpush1.bf16.msra.mxu0 %v2013_v1  ;;  %487 = vmatprep.mubr.bf16.mxu0 %v1965_v2  ;;  %p1949_p4 = pnand %p1948_p3, %p1942_p0 }
  0x14   :  { %457 = vmatprep.subr.bf16.mxu0 %v2021_v3 }
  0x17   :  { %458 = vmatpush1.bf16.msra.mxu0 %v2028_v4 }
  0x18   :  { %459 = vmatprep.subr.bf16.mxu0 %v2035_v5 }
  0x1b   :  { %460 = vmatpush1.bf16.msra.mxu0 %v2041_v6 }
  0x1c   :  { %461 = vmatprep.subr.bf16.mxu0 %v2051_v8 }
  0x1f   :  { %462 = vmatpush1.bf16.msra.mxu0 %v2061_v9 }
  0x20   :  { %599 = vmatprep.subr.bf16.mxu0 %v2008_v0 }
  0x85   :  { %v45_v15 = vpop.permute.xlu0 %44 }
  0x86   :  { %v133_v17 = vmul.f32 %v2083_v14, %v45_v15  ;;  %v134_v28 = vmul.f32 %v2092_v22, %v45_v15 }
  0x88   :  { %v177_v20 = vadd.f32 %v2089_v18, %v133_v17  ;;  %v178_v30 = vadd.f32 %v2095_v29, %v134_v28 }
  0xe5   :  { %v329_v21 = vpop.f32.mrb[0].mxu0 }
  0xe6   :  { %v330_v23 = vadd.f32 %v329_v21, %v177_v20  ;;  %v331_v24 = vpop.f32.mrb[1].mxu0 }
  0xe7   :  { %v333_v25 = vpop.f32.mrb[2].mxu0  ;;  %v332_v31 = vadd.f32 %v331_v24, %v178_v30 }
  0xe8   :  { %v1633_v26 = vmul.f32 -1.442695, %v330_v23  ;;  %v334_v27 = vpop.f32.mrb[3].mxu0 }
  0xe9   :  { %v1634_v37 = vmul.f32 -1.442695, %v332_v31 }
  0xea   :  { %1729 = vpow2.f32 %v1633_v26 }
  0xeb   :  { %1731 = vtanh.f32 %v332_v31 }
  0xf4   :  { %v1730_v32 = vpop.eup %1729 }
  0xf5   :  { %v339_v33 = vadd.f32 1.0, %v1730_v32  ;;  %v1732_v34 = vpop.eup %1731 }
  0xf7   :  { %1733 = vrcp.f32 %v339_v33 }
  0xf8   :  { %1735 = vpow2.f32 %v1634_v37 }
 0x101   :  { %v1734_v35 = vpop.eup %1733 }
 0x102   :  { %v350_v36 = vmul.f32 %v1734_v35, %v1732_v34  ;;  %v1736_v38 = vpop.eup %1735  ;;  %v349_v40 = vmul.f32 0.0, %v1734_v35 }
 0x103   :  { %v346_v39 = vadd.f32 1.0, %v1736_v38 }
 0x104   :  { %352 = vrot.lane.b32.xlu0 %v350_v36, %s1966_s1 }
 0x105   :  { %1737 = vrcp.f32 %v346_v39 }
 0x10f   :  { %v1738_v43 = vpop.eup %1737 }
 0x176   :  { %v353_v41 = vpop.permute.xlu0 %352 }
 0x177   :  { %v355_v42 = vadd.f32 %v353_v41, %v349_v40 }
 0x179   :  { %1739 = vtanh.f32 %v355_v42  ;;  %369 = vrot.lane.b32.xlu0 %v355_v42, %s1966_s1 }
 0x183   :  { %v1740_v44 = vpop.eup %1739 }
 0x184   :  { %v357_v45 = vmul.f32 %v1740_v44, %v1738_v43 }
 0x186   :  { %364 = vrot.lane.b32.xlu1 %v357_v45, %s1966_s1 }
 0x18a   :  { %49 = vperm.xlu1 %1712, %v26_v46  }
 0x1eb   :  { %v370_v48 = vpop.permute.xlu0 %369 }
 0x1ec   :  { %v372_v49 = vsel %vm360_vm0, %v370_v48, 0.0 }
 0x1ed   :  { %434 = vrot.lane.b32.xlu1 %v372_v49, %s1966_s1  ;;  %v28_v49 = vld [vmem:[%s2447_s0 + $0x18] sm:$0xff] }
 0x1f8   :  { %v365_v50 = vpop.permute.xlu1 %364 }
 0x1f9   :  { %v367_v51 = vsel %vm360_vm0, %v365_v50, 0.0 }
 0x1fa   :  { %v373_v52 = vpack.c.bf16 %v367_v51, %v367_v51 }
 0x1fc   :  { %1635 = vmatmul.mubr.msk.bf16.vlgmr.msra.gmra.mrb[0].mxu1 %vm291_vm1, %v373_v52 }
 0x1fd   :  { %528 = vmatpush1.bf16.msra.mxu1 %v2013_v1  ;;  %559 = vmatprep.mubr.bf16.mxu1 %v1965_v2 }
 0x1fe   :  { %529 = vmatprep.subr.bf16.mxu1 %v2021_v3 }
 0x201   :  { %530 = vmatpush1.bf16.msra.mxu1 %v2028_v4 }
 0x202   :  { %531 = vmatprep.subr.bf16.mxu1 %v2035_v5 }
 0x205   :  { %532 = vmatpush1.bf16.msra.mxu1 %v2041_v6 }
 0x206   :  { %533 = vmatprep.subr.bf16.mxu1 %v2051_v8 }
 0x209   :  { %534 = vmatpush1.bf16.msra.mxu1 %v2061_v9  ;;  %v50_v53 = vpop.permute.xlu1 %49 }
 0x20a   :  { %671 = vmatprep.subr.bf16.mxu1 %v2008_v0  ;;  %v135_v54 = vmul.f32 %v2083_v14, %v50_v53  ;;  %v136_v62 = vmul.f32 %v2092_v22, %v50_v53 }
 0x20c   :  { %v179_v55 = vadd.f32 %v2089_v18, %v135_v54  ;;  %v180_v63 = vadd.f32 %v2095_v29, %v136_v62 }
 0x25f   :  { %v435_v20 = vpop.permute.xlu1 %434 }
 0x2cf   :  { %v413_v56 = vpop.f32.mrb[0].mxu1 }
 0x2d0   :  { %v414_v57 = vadd.f32 %v413_v56, %v179_v55  ;;  %v415_v58 = vpop.f32.mrb[1].mxu1 }
 0x2d1   :  { %v417_v59 = vpop.f32.mrb[2].mxu1  ;;  %v416_v7 = vadd.f32 %v415_v58, %v180_v63 }
 0x2d2   :  { %v1636_v60 = vmul.f32 -1.442695, %v414_v57  ;;  %v418_v61 = vpop.f32.mrb[3].mxu1 }
 0x2d3   :  { %v1637_v17 = vmul.f32 -1.442695, %v416_v7 }
 0x2d4   :  { %1741 = vpow2.f32 %v1636_v60 }
 0x2d5   :  { %1743 = vtanh.f32 %v416_v7 }
 0x2de   :  { %v1742_v10 = vpop.eup %1741 }
 0x2df   :  { %v423_v11 = vadd.f32 1.0, %v1742_v10  ;;  %v1744_v12 = vpop.eup %1743 }
 0x2e1   :  { %1745 = vrcp.f32 %v423_v11 }
 0x2e2   :  { %1747 = vpow2.f32 %v1637_v17 }
 0x2eb   :  { %v1746_v13 = vpop.eup %1745 }
 0x2ec   :  { %v438_v15 = vmul.f32 %v1746_v13, %v1744_v12  ;;  %v1748_v19 = vpop.eup %1747  ;;  %v437_v23 = vmul.f32 %v1746_v13, %v435_v20 }
 0x2ed   :  { %v430_v21 = vadd.f32 1.0, %v1748_v19 }
 0x2ee   :  { %440 = vrot.lane.b32.xlu0 %v438_v15, %s1966_s1 }
 0x2ef   :  { %1749 = vrcp.f32 %v430_v21 }
 0x2f2   :  { %54 = vperm.xlu0 %1711, %v27_v16  }
 0x2f9   :  { %v1750_v26 = vpop.eup %1749 }
 0x360   :  { %v441_v24 = vpop.permute.xlu0 %440 }
 0x361   :  { %v443_v25 = vadd.f32 %v441_v24, %v437_v23 }
 0x363   :  { %1751 = vtanh.f32 %v443_v25 }
 0x36d   :  { %v1752_v27 = vpop.eup %1751 }
 0x36e   :  { %v445_v28 = vmul.f32 %v1752_v27, %v1750_v26  ;;  %v29_v26 = vld [vmem:[%s2447_s0 + $0x20] sm:$0xff] }
 0x370   :  { %v446_v30 = vpack.c.bf16 %v445_v28, %v445_v28 }
 0x371   :  { %v55_v32 = vpop.permute.xlu0 %54 }
 0x372   :  { %450 = vrot.lane.b32.xlu1 %v446_v30, %s1966_s1  ;;  %v137_v33 = vmul.f32 %v2083_v14, %v55_v32  ;;  %v138_v41 = vmul.f32 %v2092_v22, %v55_v32 }
 0x374   :  { %v181_v34 = vadd.f32 %v2089_v18, %v137_v33  ;;  %v182_v42 = vadd.f32 %v2095_v29, %v138_v41 }
 0x3e4   :  { %v451_v31 = vpop.permute.xlu1 %450 }
 0x3e5   :  { %1638 = vmatmul.mubr.msk.bf16.vlgmr.msra.gmra.mrb[4].mxu0 %vm291_vm1, %v451_v31 }
 0x3e6   :  { %600 = vmatpush1.bf16.msra.mxu0 %v2013_v1  ;;  %631 = vmatprep.mubr.bf16.mxu0 %v1965_v2 }
 0x3e7   :  { %601 = vmatprep.subr.bf16.mxu0 %v2021_v3 }
 0x3ea   :  { %602 = vmatpush1.bf16.msra.mxu0 %v2028_v4 }
 0x3eb   :  { %603 = vmatprep.subr.bf16.mxu0 %v2035_v5 }
 0x3ee   :  { %604 = vmatpush1.bf16.msra.mxu0 %v2041_v6 }
 0x3ef   :  { %605 = vmatprep.subr.bf16.mxu0 %v2051_v8 }
 0x3f2   :  { %606 = vmatpush1.bf16.msra.mxu0 %v2061_v9 }
 0x3f3   :  { %743 = vmatprep.subr.bf16.mxu0 %v2008_v0 }
 0x4b8   :  { %v489_v35 = vpop.f32.mrb[4].mxu0 }
 0x4b9   :  { %v490_v36 = vadd.f32 %v489_v35, %v181_v34  ;;  %v491_v37 = vpop.f32.mrb[5].mxu0 }
 0x4ba   :  { %v493_v38 = vpop.f32.mrb[6].mxu0  ;;  %v492_v43 = vadd.f32 %v491_v37, %v182_v42 }
 0x4bb   :  { %v1639_v39 = vmul.f32 -1.442695, %v490_v36  ;;  %v494_v40 = vpop.f32.mrb[7].mxu0 }
 0x4bc   :  { %v1640_v50 = vmul.f32 -1.442695, %v492_v43 }
 0x4bd   :  { %1753 = vpow2.f32 %v1639_v39 }
 0x4be   :  { %1755 = vtanh.f32 %v492_v43 }
 0x4c7   :  { %v1754_v44 = vpop.eup %1753 }
 0x4c8   :  { %v499_v45 = vadd.f32 1.0, %v1754_v44  ;;  %v1756_v46 = vpop.eup %1755 }
 0x4ca   :  { %1757 = vrcp.f32 %v499_v45 }
 0x4cb   :  { %1759 = vpow2.f32 %v1640_v50 }
 0x4d4   :  { %v1758_v47 = vpop.eup %1757 }
 0x4d5   :  { %v510_v48 = vmul.f32 %v1758_v47, %v1756_v46  ;;  %v1760_v51 = vpop.eup %1759  ;;  %v509_v53 = vmul.f32 %v1758_v47, %v443_v25 }
 0x4d6   :  { %v506_v52 = vadd.f32 1.0, %v1760_v51 }
 0x4d7   :  { %512 = vrot.lane.b32.xlu1 %v510_v48, %s1966_s1 }
 0x4d8   :  { %1761 = vrcp.f32 %v506_v52 }
 0x4db   :  { %59 = vperm.xlu1 %1712, %v28_v49  }
 0x4e2   :  { %v1762_v56 = vpop.eup %1761 }
 0x549   :  { %v513_v54 = vpop.permute.xlu1 %512 }
 0x54a   :  { %v515_v55 = vadd.f32 %v513_v54, %v509_v53 }
 0x54c   :  { %1763 = vtanh.f32 %v515_v55 }
 0x556   :  { %v1764_v57 = vpop.eup %1763 }
 0x557   :  { %v517_v58 = vmul.f32 %v1764_v57, %v1762_v56  ;;  %v30_v56 = vld [vmem:[%s2447_s0 + $0x28] sm:$0xff] }
 0x559   :  { %v518_v59 = vpack.c.bf16 %v517_v58, %v517_v58 }
 0x55a   :  { %v60_v61 = vpop.permute.xlu1 %59 }
 0x55b   :  { %522 = vrot.lane.b32.xlu0 %v518_v59, %s1966_s1  ;;  %v139_v62 = vmul.f32 %v2083_v14, %v60_v61  ;;  %v140_v16 = vmul.f32 %v2092_v22, %v60_v61 }
 0x55d   :  { %v183_v63 = vadd.f32 %v2089_v18, %v139_v62  ;;  %v184_v17 = vadd.f32 %v2095_v29, %v140_v16 }
 0x5cd   :  { %v523_v60 = vpop.permute.xlu0 %522 }
 0x5ce   :  { %1641 = vmatmul.mubr.msk.bf16.vlgmr.msra.gmra.mrb[4].mxu1 %vm291_vm1, %v523_v60 }
 0x5cf   :  { %672 = vmatpush1.bf16.msra.mxu1 %v2013_v1  ;;  %703 = vmatprep.mubr.bf16.mxu1 %v1965_v2 }
 0x5d0   :  { %673 = vmatprep.subr.bf16.mxu1 %v2021_v3 }
 0x5d3   :  { %674 = vmatpush1.bf16.msra.mxu1 %v2028_v4 }
 0x5d4   :  { %675 = vmatprep.subr.bf16.mxu1 %v2035_v5 }
 0x5d7   :  { %676 = vmatpush1.bf16.msra.mxu1 %v2041_v6 }
 0x5d8   :  { %677 = vmatprep.subr.bf16.mxu1 %v2051_v8 }
 0x5db   :  { %678 = vmatpush1.bf16.msra.mxu1 %v2061_v9 }
 0x5dc   :  { %815 = vmatprep.subr.bf16.mxu1 %v2008_v0 }
 0x6a1   :  { %v561_v7 = vpop.f32.mrb[4].mxu1 }
 0x6a2   :  { %v562_v10 = vadd.f32 %v561_v7, %v183_v63  ;;  %v563_v11 = vpop.f32.mrb[5].mxu1 }
 0x6a3   :  { %v565_v12 = vpop.f32.mrb[6].mxu1  ;;  %v564_v19 = vadd.f32 %v563_v11, %v184_v17 }
 0x6a4   :  { %v1642_v13 = vmul.f32 -1.442695, %v562_v10  ;;  %v566_v15 = vpop.f32.mrb[7].mxu1 }
 0x6a5   :  { %v1643_v27 = vmul.f32 -1.442695, %v564_v19 }
 0x6a6   :  { %1765 = vpow2.f32 %v1642_v13 }
 0x6a7   :  { %1767 = vtanh.f32 %v564_v19 }
 0x6b0   :  { %v1766_v20 = vpop.eup %1765 }
 0x6b1   :  { %v571_v21 = vadd.f32 1.0, %v1766_v20  ;;  %v1768_v23 = vpop.eup %1767 }
 0x6b3   :  { %1769 = vrcp.f32 %v571_v21 }
 0x6b4   :  { %1771 = vpow2.f32 %v1643_v27 }
 0x6bd   :  { %v1770_v24 = vpop.eup %1769 }
 0x6be   :  { %v582_v25 = vmul.f32 %v1770_v24, %v1768_v23  ;;  %v1772_v28 = vpop.eup %1771  ;;  %v581_v31 = vmul.f32 %v1770_v24, %v515_v55 }
 0x6bf   :  { %v578_v30 = vadd.f32 1.0, %v1772_v28 }
 0x6c0   :  { %584 = vrot.lane.b32.xlu0 %v582_v25, %s1966_s1 }
 0x6c1   :  { %1773 = vrcp.f32 %v578_v30 }
 0x6c4   :  { %64 = vperm.xlu0 %1711, %v29_v26  }
 0x6cb   :  { %v1774_v34 = vpop.eup %1773 }
 0x732   :  { %v585_v32 = vpop.permute.xlu0 %584 }
 0x733   :  { %v587_v33 = vadd.f32 %v585_v32, %v581_v31 }
 0x735   :  { %1775 = vtanh.f32 %v587_v33 }
 0x73f   :  { %v1776_v35 = vpop.eup %1775 }
 0x740   :  { %v589_v36 = vmul.f32 %v1776_v35, %v1774_v34  ;;  %v31_v34 = vld [vmem:[%s2447_s0 + $0x30] sm:$0xff] }
 0x742   :  { %v590_v37 = vpack.c.bf16 %v589_v36, %v589_v36 }
 0x743   :  { %v65_v39 = vpop.permute.xlu0 %64 }
 0x744   :  { %594 = vrot.lane.b32.xlu1 %v590_v37, %s1966_s1  ;;  %v141_v40 = vmul.f32 %v2083_v14, %v65_v39  ;;  %v142_v48 = vmul.f32 %v2092_v22, %v65_v39 }
 0x746   :  { %v185_v41 = vadd.f32 %v2089_v18, %v141_v40  ;;  %v186_v49 = vadd.f32 %v2095_v29, %v142_v48 }
 0x7b6   :  { %v595_v38 = vpop.permute.xlu1 %594 }
 0x7b7   :  { %1644 = vmatmul.mubr.msk.bf16.vlgmr.msra.gmra.mrb[8].mxu0 %vm291_vm1, %v595_v38 }
 0x7b8   :  { %744 = vmatpush1.bf16.msra.mxu0 %v2013_v1  ;;  %775 = vmatprep.mubr.bf16.mxu0 %v1965_v2 }
 0x7b9   :  { %745 = vmatprep.subr.bf16.mxu0 %v2021_v3 }
 0x7bc   :  { %746 = vmatpush1.bf16.msra.mxu0 %v2028_v4 }
 0x7bd   :  { %747 = vmatprep.subr.bf16.mxu0 %v2035_v5 }
 0x7c0   :  { %748 = vmatpush1.bf16.msra.mxu0 %v2041_v6 }
 0x7c1   :  { %749 = vmatprep.subr.bf16.mxu0 %v2051_v8 }
 0x7c4   :  { %750 = vmatpush1.bf16.msra.mxu0 %v2061_v9 }
 0x7c5   :  { %887 = vmatprep.subr.bf16.mxu0 %v2008_v0 }
 0x88a   :  { %v633_v42 = vpop.f32.mrb[8].mxu0 }
 0x88b   :  { %v634_v43 = vadd.f32 %v633_v42, %v185_v41  ;;  %v635_v44 = vpop.f32.mrb[9].mxu0 }
 0x88c   :  { %v637_v45 = vpop.f32.mrb[10].mxu0  ;;  %v636_v50 = vadd.f32 %v635_v44, %v186_v49 }
 0x88d   :  { %v1645_v46 = vmul.f32 -1.442695, %v634_v43  ;;  %v638_v47 = vpop.f32.mrb[11].mxu0 }
 0x88e   :  { %v1646_v57 = vmul.f32 -1.442695, %v636_v50 }
 0x88f   :  { %1777 = vpow2.f32 %v1645_v46 }
 0x890   :  { %1779 = vtanh.f32 %v636_v50 }
 0x899   :  { %v1778_v51 = vpop.eup %1777 }
 0x89a   :  { %v643_v52 = vadd.f32 1.0, %v1778_v51  ;;  %v1780_v53 = vpop.eup %1779 }
 0x89c   :  { %1781 = vrcp.f32 %v643_v52 }
 0x89d   :  { %1783 = vpow2.f32 %v1646_v57 }
 0x8a6   :  { %v1782_v54 = vpop.eup %1781 }
 0x8a7   :  { %v654_v55 = vmul.f32 %v1782_v54, %v1780_v53  ;;  %v1784_v58 = vpop.eup %1783  ;;  %v653_v60 = vmul.f32 %v1782_v54, %v587_v33 }
 0x8a8   :  { %v650_v59 = vadd.f32 1.0, %v1784_v58 }
 0x8a9   :  { %656 = vrot.lane.b32.xlu1 %v654_v55, %s1966_s1 }
 0x8aa   :  { %1785 = vrcp.f32 %v650_v59 }
 0x8ad   :  { %69 = vperm.xlu1 %1712, %v30_v56  }
 0x8b4   :  { %v1786_v63 = vpop.eup %1785 }
 0x91b   :  { %v657_v61 = vpop.permute.xlu1 %656 }
 0x91c   :  { %v659_v62 = vadd.f32 %v657_v61, %v653_v60 }
 0x91e   :  { %1787 = vtanh.f32 %v659_v62 }
 0x928   :  { %v1788_v7 = vpop.eup %1787 }
 0x929   :  { %v661_v10 = vmul.f32 %v1788_v7, %v1786_v63  ;;  %v32_v63 = vld [vmem:[%s2447_s0 + $0x38] sm:$0xff] }
 0x92b   :  { %v662_v11 = vpack.c.bf16 %v661_v10, %v661_v10 }
 0x92c   :  { %v70_v13 = vpop.permute.xlu1 %69 }
 0x92d   :  { %666 = vrot.lane.b32.xlu0 %v662_v11, %s1966_s1  ;;  %v143_v15 = vmul.f32 %v2083_v14, %v70_v13  ;;  %v144_v25 = vmul.f32 %v2092_v22, %v70_v13 }
 0x92f   :  { %v187_v16 = vadd.f32 %v2089_v18, %v143_v15  ;;  %v188_v26 = vadd.f32 %v2095_v29, %v144_v25 }
 0x99f   :  { %v667_v12 = vpop.permute.xlu0 %666 }
 0x9a0   :  { %1647 = vmatmul.mubr.msk.bf16.vlgmr.msra.gmra.mrb[8].mxu1 %vm291_vm1, %v667_v12 }
 0x9a1   :  { %816 = vmatpush1.bf16.msra.mxu1 %v2013_v1  ;;  %847 = vmatprep.mubr.bf16.mxu1 %v1965_v2 }
 0x9a2   :  { %817 = vmatprep.subr.bf16.mxu1 %v2021_v3 }
 0x9a5   :  { %818 = vmatpush1.bf16.msra.mxu1 %v2028_v4 }
 0x9a6   :  { %819 = vmatprep.subr.bf16.mxu1 %v2035_v5 }
 0x9a9   :  { %820 = vmatpush1.bf16.msra.mxu1 %v2041_v6 }
 0x9aa   :  { %821 = vmatprep.subr.bf16.mxu1 %v2051_v8 }
 0x9ad   :  { %822 = vmatpush1.bf16.msra.mxu1 %v2061_v9 }
 0x9ae   :  { %959 = vmatprep.subr.bf16.mxu1 %v2008_v0 }
 0xa73   :  { %v705_v17 = vpop.f32.mrb[8].mxu1 }
 0xa74   :  { %v706_v19 = vadd.f32 %v705_v17, %v187_v16  ;;  %v707_v20 = vpop.f32.mrb[9].mxu1 }
 0xa75   :  { %v709_v21 = vpop.f32.mrb[10].mxu1  ;;  %v708_v27 = vadd.f32 %v707_v20, %v188_v26 }
 0xa76   :  { %v1648_v23 = vmul.f32 -1.442695, %v706_v19  ;;  %v710_v24 = vpop.f32.mrb[11].mxu1 }
 0xa77   :  { %v1649_v35 = vmul.f32 -1.442695, %v708_v27 }
 0xa78   :  { %1789 = vpow2.f32 %v1648_v23 }
 0xa79   :  { %1791 = vtanh.f32 %v708_v27 }
 0xa82   :  { %v1790_v28 = vpop.eup %1789 }
 0xa83   :  { %v715_v30 = vadd.f32 1.0, %v1790_v28  ;;  %v1792_v31 = vpop.eup %1791 }
 0xa85   :  { %1793 = vrcp.f32 %v715_v30 }
 0xa86   :  { %1795 = vpow2.f32 %v1649_v35 }
 0xa8f   :  { %v1794_v32 = vpop.eup %1793 }
 0xa90   :  { %v726_v33 = vmul.f32 %v1794_v32, %v1792_v31  ;;  %v1796_v36 = vpop.eup %1795  ;;  %v725_v38 = vmul.f32 %v1794_v32, %v659_v62 }
 0xa91   :  { %v722_v37 = vadd.f32 1.0, %v1796_v36 }
 0xa92   :  { %728 = vrot.lane.b32.xlu0 %v726_v33, %s1966_s1 }
 0xa93   :  { %1797 = vrcp.f32 %v722_v37 }
 0xa96   :  { %74 = vperm.xlu0 %1711, %v31_v34  }
 0xa9d   :  { %v1798_v41 = vpop.eup %1797 }
 0xb04   :  { %v729_v39 = vpop.permute.xlu0 %728 }
 0xb05   :  { %v731_v40 = vadd.f32 %v729_v39, %v725_v38 }
 0xb07   :  { %1799 = vtanh.f32 %v731_v40 }
 0xb11   :  { %v1800_v42 = vpop.eup %1799 }
 0xb12   :  { %v733_v43 = vmul.f32 %v1800_v42, %v1798_v41  ;;  %v33_v41 = vld [vmem:[%s2447_s0 + $0x40] sm:$0xff] }
 0xb14   :  { %v734_v44 = vpack.c.bf16 %v733_v43, %v733_v43 }
 0xb15   :  { %v75_v46 = vpop.permute.xlu0 %74 }
 0xb16   :  { %738 = vrot.lane.b32.xlu1 %v734_v44, %s1966_s1  ;;  %v145_v47 = vmul.f32 %v2083_v14, %v75_v46  ;;  %v146_v55 = vmul.f32 %v2092_v22, %v75_v46 }
 0xb18   :  { %v189_v48 = vadd.f32 %v2089_v18, %v145_v47  ;;  %v190_v56 = vadd.f32 %v2095_v29, %v146_v55 }
 0xb88   :  { %v739_v45 = vpop.permute.xlu1 %738 }
 0xb89   :  { %1650 = vmatmul.mubr.msk.bf16.vlgmr.msra.gmra.mrb[12].mxu0 %vm291_vm1, %v739_v45 }
 0xb8a   :  { %888 = vmatpush1.bf16.msra.mxu0 %v2013_v1  ;;  %919 = vmatprep.mubr.bf16.mxu0 %v1965_v2 }
 0xb8b   :  { %889 = vmatprep.subr.bf16.mxu0 %v2021_v3 }
 0xb8e   :  { %890 = vmatpush1.bf16.msra.mxu0 %v2028_v4 }
 0xb8f   :  { %891 = vmatprep.subr.bf16.mxu0 %v2035_v5 }
 0xb92   :  { %892 = vmatpush1.bf16.msra.mxu0 %v2041_v6 }
 0xb93   :  { %893 = vmatprep.subr.bf16.mxu0 %v2051_v8 }
 0xb96   :  { %894 = vmatpush1.bf16.msra.mxu0 %v2061_v9 }
 0xb97   :  { %1031 = vmatprep.subr.bf16.mxu0 %v2008_v0 }
 0xc5c   :  { %v777_v49 = vpop.f32.mrb[12].mxu0 }
 0xc5d   :  { %v778_v50 = vadd.f32 %v777_v49, %v189_v48  ;;  %v779_v51 = vpop.f32.mrb[13].mxu0 }
 0xc5e   :  { %v781_v52 = vpop.f32.mrb[14].mxu0  ;;  %v780_v57 = vadd.f32 %v779_v51, %v190_v56 }
 0xc5f   :  { %v1651_v53 = vmul.f32 -1.442695, %v778_v50  ;;  %v782_v54 = vpop.f32.mrb[15].mxu0 }
 0xc60   :  { %v1652_v7 = vmul.f32 -1.442695, %v780_v57 }
 0xc61   :  { %1801 = vpow2.f32 %v1651_v53 }
 0xc62   :  { %1803 = vtanh.f32 %v780_v57 }
 0xc6b   :  { %v1802_v58 = vpop.eup %1801 }
 0xc6c   :  { %v787_v59 = vadd.f32 1.0, %v1802_v58  ;;  %v1804_v60 = vpop.eup %1803 }
 0xc6e   :  { %1805 = vrcp.f32 %v787_v59 }
 0xc6f   :  { %1807 = vpow2.f32 %v1652_v7 }
 0xc78   :  { %v1806_v61 = vpop.eup %1805 }
 0xc79   :  { %v798_v62 = vmul.f32 %v1806_v61, %v1804_v60  ;;  %v1808_v10 = vpop.eup %1807  ;;  %v797_v12 = vmul.f32 %v1806_v61, %v731_v40 }
 0xc7a   :  { %v794_v11 = vadd.f32 1.0, %v1808_v10 }
 0xc7b   :  { %800 = vrot.lane.b32.xlu1 %v798_v62, %s1966_s1 }
 0xc7c   :  { %1809 = vrcp.f32 %v794_v11 }
 0xc7f   :  { %79 = vperm.xlu1 %1712, %v32_v63  }
 0xc86   :  { %v1810_v16 = vpop.eup %1809 }
 0xced   :  { %v801_v13 = vpop.permute.xlu1 %800 }
 0xcee   :  { %v803_v15 = vadd.f32 %v801_v13, %v797_v12 }
 0xcf0   :  { %1811 = vtanh.f32 %v803_v15 }
 0xcfa   :  { %v1812_v17 = vpop.eup %1811 }
 0xcfb   :  { %v805_v19 = vmul.f32 %v1812_v17, %v1810_v16  ;;  %v34_v16 = vld [vmem:[%s2447_s0 + $0x48] sm:$0xff] }
 0xcfd   :  { %v806_v20 = vpack.c.bf16 %v805_v19, %v805_v19 }
 0xcfe   :  { %v80_v23 = vpop.permute.xlu1 %79 }
 0xcff   :  { %810 = vrot.lane.b32.xlu0 %v806_v20, %s1966_s1  ;;  %v147_v24 = vmul.f32 %v2083_v14, %v80_v23  ;;  %v148_v33 = vmul.f32 %v2092_v22, %v80_v23 }
 0xd01   :  { %v191_v25 = vadd.f32 %v2089_v18, %v147_v24  ;;  %v192_v34 = vadd.f32 %v2095_v29, %v148_v33 }
 0xd71   :  { %v811_v21 = vpop.permute.xlu0 %810 }
 0xd72   :  { %1653 = vmatmul.mubr.msk.bf16.vlgmr.msra.gmra.mrb[12].mxu1 %vm291_vm1, %v811_v21 }
 0xd73   :  { %960 = vmatpush1.bf16.msra.mxu1 %v2013_v1  ;;  %991 = vmatprep.mubr.bf16.mxu1 %v1965_v2 }
 0xd74   :  { %961 = vmatprep.subr.bf16.mxu1 %v2021_v3 }
 0xd77   :  { %962 = vmatpush1.bf16.msra.mxu1 %v2028_v4 }
 0xd78   :  { %963 = vmatprep.subr.bf16.mxu1 %v2035_v5 }
 0xd7b   :  { %964 = vmatpush1.bf16.msra.mxu1 %v2041_v6 }
 0xd7c   :  { %965 = vmatprep.subr.bf16.mxu1 %v2051_v8 }
 0xd7f   :  { %966 = vmatpush1.bf16.msra.mxu1 %v2061_v9 }
 0xd80   :  { %1103 = vmatprep.subr.bf16.mxu1 %v2008_v0 }
 0xe45   :  { %v849_v26 = vpop.f32.mrb[12].mxu1 }
 0xe46   :  { %v850_v27 = vadd.f32 %v849_v26, %v191_v25  ;;  %v851_v28 = vpop.f32.mrb[13].mxu1 }
 0xe47   :  { %v853_v30 = vpop.f32.mrb[14].mxu1  ;;  %v852_v35 = vadd.f32 %v851_v28, %v192_v34 }
 0xe48   :  { %v1654_v31 = vmul.f32 -1.442695, %v850_v27  ;;  %v854_v32 = vpop.f32.mrb[15].mxu1 }
 0xe49   :  { %v1655_v42 = vmul.f32 -1.442695, %v852_v35 }
 0xe4a   :  { %1813 = vpow2.f32 %v1654_v31 }
 0xe4b   :  { %1815 = vtanh.f32 %v852_v35 }
 0xe54   :  { %v1814_v36 = vpop.eup %1813 }
 0xe55   :  { %v859_v37 = vadd.f32 1.0, %v1814_v36  ;;  %v1816_v38 = vpop.eup %1815 }
 0xe57   :  { %1817 = vrcp.f32 %v859_v37 }
 0xe58   :  { %1819 = vpow2.f32 %v1655_v42 }
 0xe61   :  { %v1818_v39 = vpop.eup %1817 }
 0xe62   :  { %v870_v40 = vmul.f32 %v1818_v39, %v1816_v38  ;;  %v1820_v43 = vpop.eup %1819  ;;  %v869_v45 = vmul.f32 %v1818_v39, %v803_v15 }
 0xe63   :  { %v866_v44 = vadd.f32 1.0, %v1820_v43 }
 0xe64   :  { %872 = vrot.lane.b32.xlu0 %v870_v40, %s1966_s1  ;;  %v35_v40 = vld [vmem:[%s2447_s0 + $0x50] sm:$0xff] }
 0xe65   :  { %1821 = vrcp.f32 %v866_v44 }
 0xe68   :  { %84 = vperm.xlu0 %1711, %v33_v41  }
 0xe6f   :  { %v1822_v48 = vpop.eup %1821 }
 0xed6   :  { %v873_v46 = vpop.permute.xlu0 %872 }
 0xed7   :  { %v875_v47 = vadd.f32 %v873_v46, %v869_v45 }
 0xed9   :  { %1823 = vtanh.f32 %v875_v47 }
 0xee3   :  { %v1824_v49 = vpop.eup %1823 }
 0xee4   :  { %v877_v50 = vmul.f32 %v1824_v49, %v1822_v48 }
 0xee6   :  { %v878_v51 = vpack.c.bf16 %v877_v50, %v877_v50 }
 0xee7   :  { %v85_v53 = vpop.permute.xlu0 %84 }
 0xee8   :  { %882 = vrot.lane.b32.xlu1 %v878_v51, %s1966_s1  ;;  %v149_v54 = vmul.f32 %v2083_v14, %v85_v53  ;;  %v150_v62 = vmul.f32 %v2092_v22, %v85_v53  ;;  %v2287_v53 = vld [vmem:[%s2450_s3 + $0x14] ss:$8 sps:$4 sm:$0xff]  }
 0xeea   :  { %v193_v55 = vadd.f32 %v2089_v18, %v149_v54  ;;  %v194_v63 = vadd.f32 %v2095_v29, %v150_v62  ;;  %v2293_v54 = vld [vmem:[%s2450_s3 + $0x10] ss:$8 sps:$4 sm:$0xff]  }
 0xf5a   :  { %v883_v52 = vpop.permute.xlu1 %882 }
 0xf5b   :  { %1656 = vmatmul.mubr.msk.bf16.vlgmr.msra.gmra.mrb[16].mxu0 %vm291_vm1, %v883_v52  ;;  %v2280_v52 = vld [vmem:[%s2450_s3] ss:$8 sps:$4 sm:$0xff]  }
 0xf5c   :  { %1032 = vmatpush1.bf16.msra.mxu0 %v2013_v1  ;;  %1063 = vmatprep.mubr.bf16.mxu0 %v1965_v2 }
 0xf5d   :  { %1033 = vmatprep.subr.bf16.mxu0 %v2021_v3 }
 0xf60   :  { %1034 = vmatpush1.bf16.msra.mxu0 %v2028_v4 }
 0xf61   :  { %1035 = vmatprep.subr.bf16.mxu0 %v2035_v5 }
 0xf64   :  { %1036 = vmatpush1.bf16.msra.mxu0 %v2041_v6 }
 0xf65   :  { %1037 = vmatprep.subr.bf16.mxu0 %v2051_v8 }
 0xf68   :  { %1038 = vmatpush1.bf16.msra.mxu0 %v2061_v9 }
 0xf69   :  { %1175 = vmatprep.subr.bf16.mxu0 %v2008_v0 }
0x102e   :  { %v921_v56 = vpop.f32.mrb[16].mxu0 }
0x102f   :  { %v922_v57 = vadd.f32 %v921_v56, %v193_v55  ;;  %v923_v58 = vpop.f32.mrb[17].mxu0  ;;  %v2299_v55 = vld [vmem:[%s2450_s3 + $0x24] ss:$8 sps:$4 sm:$0xff]   ;;  %v2305_v56 = vld [vmem:[%s2450_s3 + $0x20] ss:$8 sps:$4 sm:$0xff]  }
0x1030   :  { %v925_v59 = vpop.f32.mrb[18].mxu0  ;;  %v924_v7 = vadd.f32 %v923_v58, %v194_v63  ;;  %v2317_v58 = vld [vmem:[%s2450_s3 + $0x30] ss:$8 sps:$4 sm:$0xff]  }
0x1031   :  { %v1657_v60 = vmul.f32 -1.442695, %v922_v57  ;;  %v926_v61 = vpop.f32.mrb[19].mxu0  ;;  %v2311_v57 = vld [vmem:[%s2450_s3 + $0x34] ss:$8 sps:$4 sm:$0xff]  }
0x1032   :  { %v1658_v17 = vmul.f32 -1.442695, %v924_v7  ;;  %v2323_v59 = vld [vmem:[%s2450_s3 + $0x4] ss:$8 sps:$4 sm:$0xff]  }
0x1033   :  { %1825 = vpow2.f32 %v1657_v60 }
0x1034   :  { %1827 = vtanh.f32 %v924_v7 }
0x103d   :  { %v1826_v10 = vpop.eup %1825 }
0x103e   :  { %v931_v11 = vadd.f32 1.0, %v1826_v10  ;;  %v1828_v12 = vpop.eup %1827 }
0x1040   :  { %1829 = vrcp.f32 %v931_v11 }
0x1041   :  { %1831 = vpow2.f32 %v1658_v17 }
0x104a   :  { %v1830_v13 = vpop.eup %1829 }
0x104b   :  { %v942_v15 = vmul.f32 %v1830_v13, %v1828_v12  ;;  %v1832_v19 = vpop.eup %1831  ;;  %v941_v21 = vmul.f32 %v1830_v13, %v875_v47 }
0x104c   :  { %v938_v20 = vadd.f32 1.0, %v1832_v19 }
0x104d   :  { %944 = vrot.lane.b32.xlu1 %v942_v15, %s1966_s1 }
0x104e   :  { %1833 = vrcp.f32 %v938_v20 }
0x1051   :  { %89 = vperm.xlu1 %1712, %v34_v16  }
0x1058   :  { %v1834_v25 = vpop.eup %1833 }
0x10bf   :  { %v945_v23 = vpop.permute.xlu1 %944 }
0x10c0   :  { %v947_v24 = vadd.f32 %v945_v23, %v941_v21 }
0x10c2   :  { %1835 = vtanh.f32 %v947_v24 }
0x10cc   :  { %v1836_v26 = vpop.eup %1835 }
0x10cd   :  { %v949_v27 = vmul.f32 %v1836_v26, %v1834_v25  ;;  %v36_v25 = vld [vmem:[%s2447_s0 + $0x58] sm:$0xff] }
0x10cf   :  { %v950_v28 = vpack.c.bf16 %v949_v27, %v949_v27 }
0x10d0   :  { %v90_v31 = vpop.permute.xlu1 %89 }
0x10d1   :  { %954 = vrot.lane.b32.xlu0 %v950_v28, %s1966_s1  ;;  %v151_v32 = vmul.f32 %v2083_v14, %v90_v31 }
0x1143   :  { %v955_v30 = vpop.permute.xlu0 %954 }
0x1144   :  { %1659 = vmatmul.mubr.msk.bf16.vlgmr.msra.gmra.mrb[16].mxu1 %vm291_vm1, %v955_v30 }
0x1145   :  { %1104 = vmatpush1.bf16.msra.mxu1 %v2013_v1  ;;  %1135 = vmatprep.mubr.bf16.mxu1 %v1965_v2  ;;  %v195_v1 = vadd.f32 %v2089_v18, %v151_v32 }
0x1146   :  { %1105 = vmatprep.subr.bf16.mxu1 %v2021_v3 }
0x1149   :  { %1106 = vmatpush1.bf16.msra.mxu1 %v2028_v4 }
0x114a   :  { %1107 = vmatprep.subr.bf16.mxu1 %v2035_v5  ;;  %v152_v5 = vmul.f32 %v2092_v22, %v90_v31 }
0x114d   :  { %1108 = vmatpush1.bf16.msra.mxu1 %v2041_v6  ;;  %v196_v6 = vadd.f32 %v2095_v29, %v152_v5 }
0x114e   :  { %1109 = vmatprep.subr.bf16.mxu1 %v2051_v8 }
0x1151   :  { %1110 = vmatpush1.bf16.msra.mxu1 %v2061_v9 }
0x1152   :  { %1247 = vmatprep.subr.bf16.mxu1 %v2008_v0 }
0x1217   :  { %v993_v33 = vpop.f32.mrb[16].mxu1 }
0x1218   :  { %v994_v34 = vadd.f32 %v993_v33, %v195_v1  ;;  %v995_v3 = vpop.f32.mrb[17].mxu1 }
0x1219   :  { %v997_v35 = vpop.f32.mrb[18].mxu1  ;;  %v996_v8 = vadd.f32 %v995_v3, %v196_v6 }
0x121a   :  { %v1660_v4 = vmul.f32 -1.442695, %v994_v34  ;;  %v998_v36 = vpop.f32.mrb[19].mxu1 }
0x121b   :  { %v1661_v41 = vmul.f32 -1.442695, %v996_v8 }
0x121c   :  { %1837 = vpow2.f32 %v1660_v4 }
0x121d   :  { %1839 = vtanh.f32 %v996_v8 }
0x1226   :  { %v1838_v9 = vpop.eup %1837 }
0x1227   :  { %v1003_v37 = vadd.f32 1.0, %v1838_v9  ;;  %v1840_v0 = vpop.eup %1839 }
0x1229   :  { %1841 = vrcp.f32 %v1003_v37 }
0x122a   :  { %1843 = vpow2.f32 %v1661_v41 }
0x1233   :  { %v1842_v38 = vpop.eup %1841 }
0x1234   :  { %v1014_v39 = vmul.f32 %v1842_v38, %v1840_v0  ;;  %v1844_v42 = vpop.eup %1843  ;;  %v1013_v44 = vmul.f32 %v1842_v38, %v947_v24 }
0x1235   :  { %v1010_v43 = vadd.f32 1.0, %v1844_v42 }
0x1236   :  { %1016 = vrot.lane.b32.xlu0 %v1014_v39, %s1966_s1 }
0x1237   :  { %1845 = vrcp.f32 %v1010_v43 }
0x123a   :  { %94 = vperm.xlu0 %1711, %v35_v40  }
0x1241   :  { %v1846_v47 = vpop.eup %1845 }
0x12a8   :  { %v1017_v45 = vpop.permute.xlu0 %1016 }
0x12a9   :  { %v1019_v46 = vadd.f32 %v1017_v45, %v1013_v44 }
0x12ab   :  { %1847 = vtanh.f32 %v1019_v46 }
0x12b5   :  { %v1848_v48 = vpop.eup %1847 }
0x12b6   :  { %v1021_v49 = vmul.f32 %v1848_v48, %v1846_v47  ;;  %v37_v47 = vld [vmem:[%s2447_s0 + $0x60] sm:$0xff] }
0x12b8   :  { %v1022_v50 = vpack.c.bf16 %v1021_v49, %v1021_v49 }
0x12b9   :  { %v95_v60 = vpop.permute.xlu0 %94 }
0x12ba   :  { %1026 = vrot.lane.b32.xlu1 %v1022_v50, %s1966_s1  ;;  %v153_v61 = vmul.f32 %v2083_v14, %v95_v60  ;;  %v154_v15 = vmul.f32 %v2092_v22, %v95_v60 }
0x12bc   :  { %v197_v62 = vadd.f32 %v2089_v18, %v153_v61  ;;  %v198_v16 = vadd.f32 %v2095_v29, %v154_v15 }
0x132c   :  { %v1027_v51 = vpop.permute.xlu1 %1026 }
0x132d   :  { %1662 = vmatmul.mubr.msk.bf16.vlgmr.msra.gmra.mrb[20].mxu0 %vm291_vm1, %v1027_v51 }
0x132e   :  { %1176 = vmatpush1.bf16.msra.mxu0 %v2280_v52  ;;  %1207 = vmatprep.mubr.bf16.mxu0 %v1965_v2 }
0x132f   :  { %1177 = vmatprep.subr.bf16.mxu0 %v2287_v53 }
0x1332   :  { %1178 = vmatpush1.bf16.msra.mxu0 %v2293_v54 }
0x1333   :  { %1179 = vmatprep.subr.bf16.mxu0 %v2299_v55 }
0x1336   :  { %1180 = vmatpush1.bf16.msra.mxu0 %v2305_v56 }
0x1337   :  { %1181 = vmatprep.subr.bf16.mxu0 %v2311_v57 }
0x133a   :  { %1182 = vmatpush1.bf16.msra.mxu0 %v2317_v58 }
0x133b   :  { %1319 = vmatprep.subr.bf16.mxu0 %v2323_v59 }
0x1400   :  { %v1065_v63 = vpop.f32.mrb[20].mxu0 }
0x1401   :  { %v1066_v7 = vadd.f32 %v1065_v63, %v197_v62  ;;  %v1067_v10 = vpop.f32.mrb[21].mxu0 }
0x1402   :  { %v1069_v11 = vpop.f32.mrb[22].mxu0  ;;  %v1068_v17 = vadd.f32 %v1067_v10, %v198_v16 }
0x1403   :  { %v1663_v12 = vmul.f32 -1.442695, %v1066_v7  ;;  %v1070_v13 = vpop.f32.mrb[23].mxu0 }
0x1404   :  { %v1664_v26 = vmul.f32 -1.442695, %v1068_v17 }
0x1405   :  { %1849 = vpow2.f32 %v1663_v12 }
0x1406   :  { %1851 = vtanh.f32 %v1068_v17 }
0x140f   :  { %v1850_v19 = vpop.eup %1849 }
0x1410   :  { %v1075_v20 = vadd.f32 1.0, %v1850_v19  ;;  %v1852_v21 = vpop.eup %1851 }
0x1412   :  { %1853 = vrcp.f32 %v1075_v20 }
0x1413   :  { %1855 = vpow2.f32 %v1664_v26 }
0x141c   :  { %v1854_v23 = vpop.eup %1853 }
0x141d   :  { %v1086_v24 = vmul.f32 %v1854_v23, %v1852_v21  ;;  %v1856_v27 = vpop.eup %1855  ;;  %v1085_v30 = vmul.f32 %v1854_v23, %v1019_v46 }
0x141e   :  { %v1082_v28 = vadd.f32 1.0, %v1856_v27 }
0x141f   :  { %1088 = vrot.lane.b32.xlu1 %v1086_v24, %s1966_s1 }
0x1420   :  { %1857 = vrcp.f32 %v1082_v28 }
0x1423   :  { %99 = vperm.xlu1 %1712, %v36_v25  }
0x142a   :  { %v1858_v1 = vpop.eup %1857 }
0x1491   :  { %v1089_v31 = vpop.permute.xlu1 %1088 }
0x1492   :  { %v1091_v32 = vadd.f32 %v1089_v31, %v1085_v30 }
0x1494   :  { %1859 = vtanh.f32 %v1091_v32 }
0x149e   :  { %v1860_v33 = vpop.eup %1859 }
0x149f   :  { %v1093_v34 = vmul.f32 %v1860_v33, %v1858_v1 }
0x14a1   :  { %v1094_v3 = vpack.c.bf16 %v1093_v34, %v1093_v34 }
0x14a2   :  { %v100_v4 = vpop.permute.xlu1 %99 }
0x14a3   :  { %1098 = vrot.lane.b32.xlu0 %v1094_v3, %s1966_s1  ;;  %v155_v36 = vmul.f32 %v2083_v14, %v100_v4  ;;  %v156_v39 = vmul.f32 %v2092_v22, %v100_v4 }
0x14a5   :  { %v199_v5 = vadd.f32 %v2089_v18, %v155_v36  ;;  %v200_v40 = vadd.f32 %v2095_v29, %v156_v39 }
0x1515   :  { %v1099_v35 = vpop.permute.xlu0 %1098 }
0x1516   :  { %1665 = vmatmul.mubr.msk.bf16.vlgmr.msra.gmra.mrb[20].mxu1 %vm291_vm1, %v1099_v35 }
0x1517   :  { %1248 = vmatpush1.bf16.msra.mxu1 %v2280_v52  ;;  %1279 = vmatprep.mubr.bf16.mxu1 %v1965_v2 }
0x1518   :  { %1249 = vmatprep.subr.bf16.mxu1 %v2287_v53 }
0x151b   :  { %1250 = vmatpush1.bf16.msra.mxu1 %v2293_v54 }
0x151c   :  { %1251 = vmatprep.subr.bf16.mxu1 %v2299_v55 }
0x151f   :  { %1252 = vmatpush1.bf16.msra.mxu1 %v2305_v56 }
0x1520   :  { %1253 = vmatprep.subr.bf16.mxu1 %v2311_v57 }
0x1523   :  { %1254 = vmatpush1.bf16.msra.mxu1 %v2317_v58 }
0x1524   :  { %1391 = vmatprep.subr.bf16.mxu1 %v2323_v59 }
0x15e9   :  { %v1137_v6 = vpop.f32.mrb[20].mxu1 }
0x15ea   :  { %v1138_v8 = vadd.f32 %v1137_v6, %v199_v5  ;;  %v1139_v9 = vpop.f32.mrb[21].mxu1 }
0x15eb   :  { %v1141_v37 = vpop.f32.mrb[22].mxu1  ;;  %v1140_v41 = vadd.f32 %v1139_v9, %v200_v40 }
0x15ec   :  { %v1666_v0 = vmul.f32 -1.442695, %v1138_v8  ;;  %v1142_v38 = vpop.f32.mrb[23].mxu1 }
0x15ed   :  { %v1667_v48 = vmul.f32 -1.442695, %v1140_v41 }
0x15ee   :  { %1861 = vpow2.f32 %v1666_v0 }
0x15ef   :  { %1863 = vtanh.f32 %v1140_v41 }
0x15f8   :  { %v1862_v42 = vpop.eup %1861 }
0x15f9   :  { %v1147_v43 = vadd.f32 1.0, %v1862_v42  ;;  %v1864_v44 = vpop.eup %1863 }
0x15fb   :  { %1865 = vrcp.f32 %v1147_v43 }
0x15fc   :  { %1867 = vpow2.f32 %v1667_v48 }
0x1605   :  { %v1866_v45 = vpop.eup %1865 }
0x1606   :  { %v1158_v46 = vmul.f32 %v1866_v45, %v1864_v44  ;;  %v1868_v49 = vpop.eup %1867  ;;  %v1157_v51 = vmul.f32 %v1866_v45, %v1091_v32  ;;  %v38_v32 = vld [vmem:[%s2447_s0 + $0x68] sm:$0xff] }
0x1607   :  { %v1154_v50 = vadd.f32 1.0, %v1868_v49 }
0x1608   :  { %1160 = vrot.lane.b32.xlu0 %v1158_v46, %s1966_s1 }
0x1609   :  { %1869 = vrcp.f32 %v1154_v50 }
0x160c   :  { %104 = vperm.xlu0 %1711, %v37_v47  }
0x1613   :  { %v1870_v62 = vpop.eup %1869 }
0x167a   :  { %v1161_v60 = vpop.permute.xlu0 %1160 }
0x167b   :  { %v1163_v61 = vadd.f32 %v1161_v60, %v1157_v51 }
0x167d   :  { %1871 = vtanh.f32 %v1163_v61 }
0x1687   :  { %v1872_v63 = vpop.eup %1871 }
0x1688   :  { %v1165_v7 = vmul.f32 %v1872_v63, %v1870_v62 }
0x168a   :  { %v1166_v10 = vpack.c.bf16 %v1165_v7, %v1165_v7 }
0x168b   :  { %v105_v12 = vpop.permute.xlu0 %104 }
0x168c   :  { %1170 = vrot.lane.b32.xlu1 %v1166_v10, %s1966_s1  ;;  %v157_v13 = vmul.f32 %v2083_v14, %v105_v12  ;;  %v158_v24 = vmul.f32 %v2092_v22, %v105_v12 }
0x168e   :  { %v201_v15 = vadd.f32 %v2089_v18, %v157_v13  ;;  %v202_v25 = vadd.f32 %v2095_v29, %v158_v24 }
0x16fe   :  { %v1171_v11 = vpop.permute.xlu1 %1170 }
0x16ff   :  { %1668 = vmatmul.mubr.msk.bf16.vlgmr.msra.gmra.mrb[24].mxu0 %vm291_vm1, %v1171_v11 }
0x1700   :  { %1320 = vmatpush1.bf16.msra.mxu0 %v2280_v52  ;;  %1351 = vmatprep.mubr.bf16.mxu0 %v1965_v2 }
0x1701   :  { %1321 = vmatprep.subr.bf16.mxu0 %v2287_v53 }
0x1704   :  { %1322 = vmatpush1.bf16.msra.mxu0 %v2293_v54 }
0x1705   :  { %1323 = vmatprep.subr.bf16.mxu0 %v2299_v55 }
0x1708   :  { %1324 = vmatpush1.bf16.msra.mxu0 %v2305_v56 }
0x1709   :  { %1325 = vmatprep.subr.bf16.mxu0 %v2311_v57 }
0x170c   :  { %1326 = vmatpush1.bf16.msra.mxu0 %v2317_v58 }
0x170d   :  { %1461 = vmatprep.subr.bf16.mxu0 %v2323_v59 }
0x17d2   :  { %v1209_v16 = vpop.f32.mrb[24].mxu0 }
0x17d3   :  { %v1210_v17 = vadd.f32 %v1209_v16, %v201_v15  ;;  %v1211_v19 = vpop.f32.mrb[25].mxu0 }
0x17d4   :  { %v1213_v20 = vpop.f32.mrb[26].mxu0  ;;  %v1212_v26 = vadd.f32 %v1211_v19, %v202_v25 }
0x17d5   :  { %v1669_v21 = vmul.f32 -1.442695, %v1210_v17  ;;  %v1214_v23 = vpop.f32.mrb[27].mxu0 }
0x17d6   :  { %v1670_v1 = vmul.f32 -1.442695, %v1212_v26 }
0x17d7   :  { %1873 = vpow2.f32 %v1669_v21 }
0x17d8   :  { %1875 = vtanh.f32 %v1212_v26 }
0x17e1   :  { %v1874_v27 = vpop.eup %1873 }
0x17e2   :  { %v1219_v28 = vadd.f32 1.0, %v1874_v27  ;;  %v1876_v59 = vpop.eup %1875 }
0x17e4   :  { %1877 = vrcp.f32 %v1219_v28 }
0x17e5   :  { %1879 = vpow2.f32 %v1670_v1 }
0x17ee   :  { %v1878_v30 = vpop.eup %1877 }
0x17ef   :  { %v1230_v31 = vmul.f32 %v1878_v30, %v1876_v59  ;;  %v1880_v33 = vpop.eup %1879  ;;  %v1229_v3 = vmul.f32 %v1878_v30, %v1163_v61  ;;  %v39_v61 = vld [vmem:[%s2447_s0 + $0x70] sm:$0xff]  ;;  %v40_v30 = vld [vmem:[%s2447_s0 + $0x78] sm:$0xff] }
0x17f0   :  { %v1226_v34 = vadd.f32 1.0, %v1880_v33 }
0x17f1   :  { %1232 = vrot.lane.b32.xlu1 %v1230_v31, %s1966_s1 }
0x17f2   :  { %1881 = vrcp.f32 %v1226_v34 }
0x17f5   :  { %109 = vperm.xlu1 %1712, %v38_v32  }
0x17fc   :  { %v1882_v36 = vpop.eup %1881 }
0x1863   :  { %v1233_v35 = vpop.permute.xlu1 %1232 }
0x1864   :  { %v1235_v4 = vadd.f32 %v1233_v35, %v1229_v3 }
0x1866   :  { %1883 = vtanh.f32 %v1235_v4 }
0x1870   :  { %v1884_v5 = vpop.eup %1883 }
0x1871   :  { %v1237_v6 = vmul.f32 %v1884_v5, %v1882_v36 }
0x1873   :  { %v1238_v8 = vpack.c.bf16 %v1237_v6, %v1237_v6 }
0x1874   :  { %v110_v37 = vpop.permute.xlu1 %109 }
0x1875   :  { %1242 = vrot.lane.b32.xlu0 %v1238_v8, %s1966_s1  ;;  %v159_v0 = vmul.f32 %v2083_v14, %v110_v37  ;;  %v160_v45 = vmul.f32 %v2092_v22, %v110_v37 }
0x1877   :  { %v203_v38 = vadd.f32 %v2089_v18, %v159_v0  ;;  %v204_v46 = vadd.f32 %v2095_v29, %v160_v45 }
0x18e7   :  { %v1243_v9 = vpop.permute.xlu0 %1242 }
0x18e8   :  { %1671 = vmatmul.mubr.msk.bf16.vlgmr.msra.gmra.mrb[24].mxu1 %vm291_vm1, %v1243_v9 }
0x18e9   :  { %1392 = vmatpush1.bf16.msra.mxu1 %v2280_v52  ;;  %1423 = vmatprep.mubr.bf16.mxu1 %v1965_v2 }
0x18ea   :  { %1393 = vmatprep.subr.bf16.mxu1 %v2287_v53 }
0x18ed   :  { %1394 = vmatpush1.bf16.msra.mxu1 %v2293_v54 }
0x18ee   :  { %1395 = vmatprep.subr.bf16.mxu1 %v2299_v55 }
0x18f1   :  { %1396 = vmatpush1.bf16.msra.mxu1 %v2305_v56 }
0x18f2   :  { %1397 = vmatprep.subr.bf16.mxu1 %v2311_v57 }
0x18f5   :  { %1398 = vmatpush1.bf16.msra.mxu1 %v2317_v58 }
0x19bb   :  { %v1281_v39 = vpop.f32.mrb[24].mxu1 }
0x19bc   :  { %v1282_v40 = vadd.f32 %v1281_v39, %v203_v38  ;;  %v1283_v41 = vpop.f32.mrb[25].mxu1 }
0x19bd   :  { %v1285_v42 = vpop.f32.mrb[26].mxu1  ;;  %v1284_v47 = vadd.f32 %v1283_v41, %v204_v46 }
0x19be   :  { %v1672_v43 = vmul.f32 -1.442695, %v1282_v40  ;;  %v1286_v44 = vpop.f32.mrb[27].mxu1 }
0x19bf   :  { %v1673_v62 = vmul.f32 -1.442695, %v1284_v47 }
0x19c0   :  { %1885 = vpow2.f32 %v1672_v43 }
0x19c1   :  { %1887 = vtanh.f32 %v1284_v47 }
0x19ca   :  { %v1886_v48 = vpop.eup %1885 }
0x19cb   :  { %v1291_v49 = vadd.f32 1.0, %v1886_v48  ;;  %v1888_v50 = vpop.eup %1887 }
0x19cd   :  { %1889 = vrcp.f32 %v1291_v49 }
0x19ce   :  { %1891 = vpow2.f32 %v1673_v62 }
0x19d7   :  { %v1890_v51 = vpop.eup %1889 }
0x19d8   :  { %v1302_v60 = vmul.f32 %v1890_v51, %v1888_v50  ;;  %v1892_v63 = vpop.eup %1891  ;;  %v1301_v10 = vmul.f32 %v1890_v51, %v1235_v4 }
0x19d9   :  { %v1298_v7 = vadd.f32 1.0, %v1892_v63 }
0x19da   :  { %1304 = vrot.lane.b32.xlu0 %v1302_v60, %s1966_s1 }
0x19db   :  { %1893 = vrcp.f32 %v1298_v7 }
0x19de   :  { %114 = vperm.xlu0 %1711, %v39_v61  }
0x19e5   :  { %v1894_v13 = vpop.eup %1893 }
0x1a4c   :  { %v1305_v11 = vpop.permute.xlu0 %1304 }
0x1a4d   :  { %v1307_v12 = vadd.f32 %v1305_v11, %v1301_v10 }
0x1a4f   :  { %1895 = vtanh.f32 %v1307_v12 }
0x1a59   :  { %v1896_v15 = vpop.eup %1895 }
0x1a5a   :  { %v1309_v16 = vmul.f32 %v1896_v15, %v1894_v13 }
0x1a5c   :  { %v1310_v17 = vpack.c.bf16 %v1309_v16, %v1309_v16 }
0x1a5d   :  { %v115_v20 = vpop.permute.xlu0 %114 }
0x1a5e   :  { %1314 = vrot.lane.b32.xlu1 %v1310_v17, %s1966_s1  ;;  %v161_v21 = vmul.f32 %v2083_v14, %v115_v20 }
0x1a60   :  { %v205_v23 = vadd.f32 %v2089_v18, %v161_v21 }
0x1ad0   :  { %v1315_v19 = vpop.permute.xlu1 %1314 }
0x1ad1   :  { %1674 = vmatmul.mubr.msk.bf16.vlgmr.msra.gmra.mrb[28].mxu0 %vm291_vm1, %v1315_v19 }
0x1ad2   :  { %1462 = vmatpush1.bf16.msra.mxu0 %v2280_v52  ;;  %1493 = vmatprep.mubr.bf16.mxu0 %v1965_v2 }
0x1ad3   :  { %1463 = vmatprep.subr.bf16.mxu0 %v2287_v53 }
0x1ad6   :  { %1464 = vmatpush1.bf16.msra.mxu0 %v2293_v54  ;;  %v162_v54 = vmul.f32 %v2092_v22, %v115_v20 }
0x1ad7   :  { %1465 = vmatprep.subr.bf16.mxu0 %v2299_v55 }
0x1ad8   :  { %v206_v55 = vadd.f32 %v2095_v29, %v162_v54  ;;  %v1728_v54 = vld [vmem:[%s2451_s4 + $0x18] sm:$0xff]  }
0x1ada   :  { %1466 = vmatpush1.bf16.msra.mxu0 %v2305_v56 }
0x1adb   :  { %1467 = vmatprep.subr.bf16.mxu0 %v2311_v57 }
0x1ade   :  { %1468 = vmatpush1.bf16.msra.mxu0 %v2317_v58 }
0x1ba4   :  { %v1353_v52 = vpop.f32.mrb[28].mxu0 }
0x1ba5   :  { %v1354_v24 = vadd.f32 %v1353_v52, %v205_v23  ;;  %v1355_v2 = vpop.f32.mrb[29].mxu0 }
0x1ba6   :  { %v1357_v25 = vpop.f32.mrb[30].mxu0  ;;  %v1356_v56 = vadd.f32 %v1355_v2, %v206_v55  ;;  %v1725_v2 = vld [vmem:[%s2451_s4] sm:$0xff]  }
0x1ba7   :  { %v1675_v53 = vmul.f32 -1.442695, %v1354_v24  ;;  %v1358_v26 = vpop.f32.mrb[31].mxu0  ;;  %v1967_v25 = vmov 0.0  }
0x1ba8   :  { %v1676_v31 = vmul.f32 -1.442695, %v1356_v56  ;;  %1694 = vmatprep.subr.bf16.mxu1 %v1967_v25  ;;  %v1727_v26 = vld [vmem:[%s2451_s4 + $0x10] sm:$0xff]  }
0x1ba9   :  { %1897 = vpow2.f32 %v1675_v53  ;;  %v1726_v53 = vld [vmem:[%s2451_s4 + $0x8] sm:$0xff]  }
0x1baa   :  { %1899 = vtanh.f32 %v1356_v56 }
0x1bb3   :  { %v1898_v57 = vpop.eup %1897 }
0x1bb4   :  { %v1363_v27 = vadd.f32 1.0, %v1898_v57  ;;  %v1900_v58 = vpop.eup %1899 }
0x1bb6   :  { %1901 = vrcp.f32 %v1363_v27 }
0x1bb7   :  { %1903 = vpow2.f32 %v1676_v31 }
0x1bc0   :  { %v1902_v28 = vpop.eup %1901 }
0x1bc1   :  { %v1374_v59 = vmul.f32 %v1902_v28, %v1900_v58  ;;  %v1904_v32 = vpop.eup %1903  ;;  %v1373_v33 = vmul.f32 %v1902_v28, %v1307_v12 }
0x1bc2   :  { %v1370_v1 = vadd.f32 1.0, %v1904_v32 }
0x1bc3   :  { %1376 = vrot.lane.b32.xlu1 %v1374_v59, %s1966_s1 }
0x1bc4   :  { %1905 = vrcp.f32 %v1370_v1 }
0x1bc7   :  { %119 = vperm.xlu1 %1712, %v40_v30  }
0x1bce   :  { %v1906_v35 = vpop.eup %1905 }
0x1c35   :  { %v1377_v34 = vpop.permute.xlu1 %1376 }
0x1c36   :  { %v1379_v3 = vadd.f32 %v1377_v34, %v1373_v33  ;;  %v1683_v33 = vld [vmem:[%s2452_s5] ss:$0 sm:$0xff] }
0x1c38   :  { %1907 = vtanh.f32 %v1379_v3 }
0x1c42   :  { %v1908_v4 = vpop.eup %1907 }
0x1c43   :  { %v1381_v36 = vmul.f32 %v1908_v4, %v1906_v35 }
0x1c45   :  { %v1382_v5 = vpack.c.bf16 %v1381_v36, %v1381_v36 }
0x1c46   :  { %v120_v8 = vpop.permute.xlu1 %119 }
0x1c47   :  { %1386 = vrot.lane.b32.xlu0 %v1382_v5, %s1966_s1  ;;  %v163_v9 = vmul.f32 %v2083_v14, %v120_v8  ;;  %v164_v43 = vmul.f32 %v2092_v22, %v120_v8 }
0x1c49   :  { %v207_v37 = vadd.f32 %v2089_v18, %v163_v9  ;;  %v208_v44 = vadd.f32 %v2095_v29, %v164_v43 }
0x1cb9   :  { %v1387_v6 = vpop.permute.xlu0 %1386 }
0x1cba   :  { %1677 = vmatmul.mubr.msk.bf16.vlgmr.msra.gmra.mrb[28].mxu1 %vm291_vm1, %v1387_v6 }
0x1cbb   :  { %1702 = vmatprep.mubr.msk.bf16.mxu1 %vm1968_vm2, %v1967_v25  ;;  %1695 = vmatpush3.bf16.msra.mxu1 %v1725_v2 }
0x1cbc   :  { %1696 = vmatprep.subr.bf16.mxu1 %v1967_v25 }
0x1cbf   :  { %1697 = vmatpush3.bf16.msra.mxu1 %v1726_v53 }
0x1cc0   :  { %1698 = vmatprep.subr.bf16.mxu1 %v1967_v25 }
0x1cc3   :  { %1699 = vmatpush3.bf16.msra.mxu1 %v1727_v26 }
0x1cc4   :  { %1700 = vmatprep.subr.bf16.mxu1 %v1967_v25 }
0x1cc7   :  { %1701 = vmatpush3.bf16.msra.mxu1 %v1728_v54 }
0x1d8d   :  { %v1425_v0 = vpop.f32.mrb[28].mxu1 }
0x1d8e   :  { %v1426_v38 = vadd.f32 %v1425_v0, %v207_v37  ;;  %v1427_v39 = vpop.f32.mrb[29].mxu1 }
0x1d8f   :  { %v1429_v40 = vpop.f32.mrb[30].mxu1  ;;  %v1428_v45 = vadd.f32 %v1427_v39, %v208_v44 }
0x1d90   :  { %v1678_v41 = vmul.f32 -1.442695, %v1426_v38  ;;  %v1430_v42 = vpop.f32.mrb[31].mxu1 }
0x1d91   :  { %v1679_v18 = vmul.f32 -1.442695, %v1428_v45 }
0x1d92   :  { %1909 = vpow2.f32 %v1678_v41 }
0x1d93   :  { %1911 = vtanh.f32 %v1428_v45 }
0x1d9c   :  { %v1910_v46 = vpop.eup %1909 }
0x1d9d   :  { %v1435_v47 = vadd.f32 1.0, %v1910_v46  ;;  %v1912_v48 = vpop.eup %1911 }
0x1d9f   :  { %1913 = vrcp.f32 %v1435_v47 }
0x1da0   :  { %1915 = vpow2.f32 %v1679_v18 }
0x1da9   :  { %v1914_v14 = vpop.eup %1913 }
0x1daa   :  { %v1446_v49 = vmul.f32 %v1914_v14, %v1912_v48  ;;  %v1916_v50 = vpop.eup %1915  ;;  %v1445_v60 = vmul.f32 %v1914_v14, %v1379_v3 }
0x1dab   :  { %v1442_v51 = vadd.f32 1.0, %v1916_v50 }
0x1dac   :  { %1448 = vrot.lane.b32.xlu0 %v1446_v49, %s1966_s1 }
0x1dad   :  { %1917 = vrcp.f32 %v1442_v51 }
0x1db7   :  { %v1918_v22 = vpop.eup %1917 }
0x1e1e   :  { %v1449_v61 = vpop.permute.xlu0 %1448 }
0x1e1f   :  { %v1451_v62 = vadd.f32 %v1449_v61, %v1445_v60 }
0x1e21   :  { %1919 = vtanh.f32 %v1451_v62 }
0x1e2b   :  { %v1920_v29 = vpop.eup %1919 }
0x1e2c   :  { %v1453_v63 = vmul.f32 %v1920_v29, %v1918_v22 }
0x1e2e   :  { %v1454_v7 = vpack.c.bf16 %v1453_v63, %v1453_v63 }
0x1e30   :  { %1456 = vrot.lane.b32.xlu1 %v1454_v7, %s1966_s1 }
0x1ea2   :  { %v1457_v10 = vpop.permute.xlu1 %1456 }
0x1ea3   :  { %1680 = vmatmul.mubr.msk.bf16.vlgmr.msra.gmra.mrb[32].mxu0 %vm291_vm1, %v1457_v10 }
0x1f76   :  { %v1495_v11 = vpop.f32.mrb[32].mxu0 }
0x1f77   :  { %v1496_v12 = vadd.f32 %v1495_v11, %v207_v37  ;;  %v1497_v13 = vpop.f32.mrb[33].mxu0 }
0x1f78   :  { %v1499_v15 = vpop.f32.mrb[34].mxu0  ;;  %v1498_v19 = vadd.f32 %v1497_v13, %v208_v44 }
0x1f79   :  { %v1681_v16 = vmul.f32 -1.442695, %v1496_v12  ;;  %v1500_v17 = vpop.f32.mrb[35].mxu0 }
0x1f7a   :  { %v1682_v55 = vmul.f32 -1.442695, %v1498_v19 }
0x1f7b   :  { %1921 = vpow2.f32 %v1681_v16 }
0x1f7c   :  { %1923 = vtanh.f32 %v1498_v19 }
0x1f85   :  { %v1922_v20 = vpop.eup %1921 }
0x1f86   :  { %v1505_v21 = vadd.f32 1.0, %v1922_v20  ;;  %v1924_v23 = vpop.eup %1923 }
0x1f88   :  { %1925 = vrcp.f32 %v1505_v21 }
0x1f89   :  { %1927 = vpow2.f32 %v1682_v55 }
0x1f92   :  { %v1926_v52 = vpop.eup %1925 }
0x1f93   :  { %v1516_v24 = vmul.f32 %v1926_v52, %v1924_v23  ;;  %v1928_v56 = vpop.eup %1927  ;;  %v1515_v27 = vmul.f32 %v1926_v52, %v1451_v62 }
0x1f94   :  { %v1512_v57 = vadd.f32 1.0, %v1928_v56 }
0x1f95   :  { %1518 = vrot.lane.b32.xlu0 %v1516_v24, %s1966_s1 }
0x1f96   :  { %1929 = vrcp.f32 %v1512_v57 }
0x1fa0   :  { %v1930_v59 = vpop.eup %1929 }
0x2007   :  { %v1519_v58 = vpop.permute.xlu0 %1518 }
0x2008   :  { %v1521_v28 = vadd.f32 %v1519_v58, %v1515_v27 }
0x200a   :  { %1931 = vtanh.f32 %v1521_v28 }
0x2014   :  { %v1932_v30 = vpop.eup %1931 }
0x2015   :  { %v1523_v31 = vmul.f32 %v1932_v30, %v1930_v59 }
0x2017   :  { %v1524_v32 = vpack.c.bf16 %v1523_v31, %v1523_v31 }
0x2019   :  { %1541 = vrot.lane.b32.xlu1 %v1524_v32, %s1966_s1 }
0x208b   :  { %v1542_v1 = vpop.permute.xlu1 %1541 }
0x208c   :  { %1703 = vmatmul.mubr.msk.bf16.vlgmr.msra.gmra.mrb[32].mxu1 %vm291_vm1, %v1542_v1 }
0x215f   :  { %v1604_v34 = vpop.f32.mrb[32].mxu1 }
0x2160   :  { %v1605_v3 = vadd.f32 %v1683_v33, %v1604_v34  ;;  %v1704_v35 = vpop.f32.mrb[33].mxu1 }
0x2161   :  { %v1607_v4 = vpop.f32.mrb[34].mxu1 }
0x2162   :  { %1610 = vst [vmem:[#allocation3] sm:$0xff] %v1605_v3  ;;  %v1705_v36 = vpop.f32.mrb[35].mxu1 }
0x2163   :  { %1952 = shalt.err (!%p1949_p4)
}
0x2164   :  { %s1953_s5 = scalar_lea.hbm %s2453_s6, 128 }
0x2165   :  { %p1954_p5 = scmp.ne.s32.totalorder %s2453_s6, %s1953_s5  ;;  %p1957_p6 = scmp.lt.u32.totalorder %s1953_s5, %s2453_s6 }
0x2167   :  { %p1959_p7 = pnand %p1957_p6, %p1954_p5 }
0x2169   :  { %1962 = shalt.err (!%p1959_p7)
}
0x216a   :  { %1620 = dma.vmem_to_hbm [thread:$0]  %s1618_s22, 128, %s2453_s6, [#allocation4]  }
0x216b   :  { %1963 = dma.done.wait [#allocation4], 128  }
0x216c   :  { %1964 = vsyncadd [#allocation4], 4294967168 }
0x216d   :  { %1624 = vsyncpa [#allocation4], 1 }

</bundles_post_ra>
